<compile_context>
chip_gen: v7x
topology: tpu7x:2x2x1
jax: 0.10.0
libtpu: 0.0.40
codegen_flags: <defaults>
</compile_context>

<pallas_src>
import jax
import jax.numpy as jnp
import numpy as np
from jax import lax
from jax.experimental import pallas as pl
from jax.experimental.pallas import tpu as pltpu


def _pick_row_tile(H, W, max_pixels_per_tile=16384):
    """Largest row-tile height TH (multiple of 4, divides H, TH*W % 128 == 0,
    TH*W <= max_pixels_per_tile).  Falls back to TH == H (always legal)."""
    best = None
    for th in range(4, H + 1, 4):
        if th * W > max_pixels_per_tile:
            break
        if H % th:
            continue
        if (th * W) % 128:
            continue
        best = th
    return best if best is not None else H


def _pick_halo_rows(TH, W):
    """Smallest halo block height HR >= 4 with HR | TH and (HR*W) % 128 == 0."""
    for hr in range(4, TH + 1, 4):
        if TH % hr == 0 and (hr * W) % 128 == 0:
            return hr
    return TH


def _make_kernel(W, TH, nT, HR):
    L1 = (TH + 6) * W                 # largest conv output length (conv1)
    ZW = (TH + 8) * W + 2             # activation buffer width (guard + data + guard)

    def kernel(xprev_ref, xcur_ref, xnext_ref,
               w1_ref, b1_ref, w2_ref, b2_ref, a_ref,
               w3_ref, b3_ref, w4_ref, b4_ref,
               out_ref, abuf, bbuf, imbuf):
        t = pl.program_id(1)
        bf16 = jnp.bfloat16

        # Hoisted column masks (W-periodic => prefix slices valid for every conv).
        col = lax.broadcasted_iota(jnp.int32, (1, L1), 1) % W
        ok_l = col != 0            # kw == 0 taps invalid at image column 0
        ok_r = col != (W - 1)      # kw == 2 taps invalid at image column W-1

        def conv3x3(src, r_in, w_ref, b_ref):
            """3x3 'same' conv as ONE matmul: build a (72, L) im2col slab from 9
            static lane-shifted (8, L) slices of `src`, then a single bf16 MXU
            dot with f32 accumulation.  Unused channel rows of `src` are zero,
            matching zero weight columns, so no masks beyond the column edges."""
            L = (r_in - 2) * W
            for kh in range(3):
                for kw in range(3):
                    k = kh * 3 + kw
                    s = kh * W + kw
                    tap = src[0:8, s:s + L]                       # (8, L) bf16
                    if kw == 0:
                        tap = jnp.where(ok_l[:, :L], tap, jnp.zeros_like(tap))
                    elif kw == 2:
                        tap = jnp.where(ok_r[:, :L], tap, jnp.zeros_like(tap))
                    imbuf[8 * k:8 * k + 8, 0:L] = tap
            y = jnp.dot(w_ref[...], imbuf[0:72, 0:L],
                        preferred_element_type=jnp.float32)       # (cout, L) f32
            return y + b_ref[...]

        def zero_oob(buf, k, r_len):
            # Zero the k out-of-image halo rows of the intermediate held in buf
            # (r_len rows total) -- boundary tiles only, tiny stores.
            @pl.when(t == 0)
            def _():
                buf[0:6, 1:1 + k * W] = jnp.zeros((6, k * W), bf16)

            @pl.when(t == nT - 1)
            def _():
                buf[0:6, 1 + (r_len - k) * W:1 + r_len * W] = (
                    jnp.zeros((6, k * W), bf16))

        # Unused channel rows must be exact zeros: they are copied into the
        # 8-row im2col groups and meet zero weight columns (0 * NaN != 0).
        abuf[3:8, :] = jnp.zeros((5, ZW), bf16)
        bbuf[6:8, :] = jnp.zeros((2, ZW), bf16)
        # Guard lanes ever read by (masked) edge taps: make them initialized.
        abuf[0:3, 0:1] = jnp.zeros((3, 1), bf16)
        abuf[0:3, ZW - 1:ZW] = jnp.zeros((3, 1), bf16)
        bbuf[0:6, 0:1] = jnp.zeros((6, 1), bf16)
        bbuf[0:6, (TH + 6) * W + 1:(TH + 6) * W + 2] = jnp.zeros((6, 1), bf16)

        # ---- stage x rows [-4, TH+4): small HR-row halo blocks + current tile.
        top = jnp.where(t > 0, xprev_ref[0, :, (HR - 4) * W:HR * W], 0.0)
        bot = jnp.where(t < nT - 1, xnext_ref[0, :, 0:4 * W], 0.0)
        abuf[0:3, 1:1 + 4 * W] = top.astype(bf16)
        abuf[0:3, 1 + 4 * W:1 + (4 + TH) * W] = xcur_ref[0].astype(bf16)
        abuf[0:3, 1 + (4 + TH) * W:1 + (8 + TH) * W] = bot.astype(bf16)

        # ---- conv1: 3 -> 6, rows [-4, TH+4) -> [-3, TH+3) ----
        y1 = conv3x3(abuf, TH + 8, w1_ref, b1_ref)                # (6, (TH+6)*W)
        bbuf[0:6, 1:1 + (TH + 6) * W] = y1.astype(bf16)
        zero_oob(bbuf, 3, TH + 6)

        # ---- bottleneck conv #1 + PReLU: 6 -> 6, rows -> [-2, TH+2) ----
        y2 = conv3x3(bbuf, TH + 6, w2_ref, b2_ref)                # (6, (TH+4)*W)
        alpha = a_ref[0, 0]
        y2 = jnp.where(y2 >= 0, y2, alpha * y2)
        abuf[0:6, 1:1 + (TH + 4) * W] = y2.astype(bf16)
        zero_oob(abuf, 2, TH + 4)

        # ---- bottleneck conv #2 + residual skip: rows -> [-1, TH+1) ----
        y3 = conv3x3(abuf, TH + 4, w3_ref, b3_ref)                # (6, (TH+2)*W)
        y3 = y3 + bbuf[0:6, 1 + 2 * W:1 + (TH + 4) * W].astype(jnp.float32)
        abuf[0:6, 1:1 + (TH + 2) * W] = y3.astype(bf16)
        zero_oob(abuf, 1, TH + 2)

        # ---- last conv: 6 -> 48, rows -> [0, TH); lane-dense f32 store ----
        y4 = conv3x3(abuf, TH + 2, w4_ref, b4_ref)                # (48, TH*W)
        out_ref[0] = y4

    return kernel


def elsr_x4_forward(x_nchw, params, row_tile=None,
                    max_pixels_per_tile=16384,
                    vmem_limit_bytes=32 * 1024 * 1024):
    """ESLR_x4 forward: (N, 3, H, W) f32 -> (N, 3, 4H, 4W) f32."""
    N, C, H, W = x_nchw.shape
    assert C == 3
    TH = _pick_row_tile(H, W, max_pixels_per_tile) if row_tile is None else row_tile
    assert H % TH == 0 and TH >= 4
    assert (TH * W) % 128 == 0 or TH == H, "row tile must give lane-dense blocks"
    nT = H // TH
    HR = _pick_halo_rows(TH, W)
    tpb = TH // HR            # halo blocks per row tile
    nHB = H // HR             # total halo blocks along rows

    xflat = x_nchw.reshape(N, 3, H * W)   # planar flattened-spatial view (free)

    w1, b1, w2, b2, alpha, w3, b3, w4, b4 = params

    def w_mat(w_oihw):
        # PyTorch (O, I, 3, 3) -> (O, 72) bf16, column 8*(kh*3+kw)+ci,
        # zero-padded channel slots (matches the 8-aligned im2col groups).
        o, i = w_oihw.shape[0], w_oihw.shape[1]
        wt = jnp.transpose(w_oihw, (0, 2, 3, 1)).reshape(o, 9, i)
        wt = jnp.pad(wt, ((0, 0), (0, 0), (0, 8 - i)))
        return wt.reshape(o, 72).astype(jnp.bfloat16)

    inputs = (xflat, xflat, xflat,                 # prev-halo / current / next-halo
              w_mat(w1), b1.reshape(-1, 1),
              w_mat(w2), b2.reshape(-1, 1),
              alpha.reshape(1, 1),
              w_mat(w3), b3.reshape(-1, 1),
              w_mat(w4), b4.reshape(-1, 1))

    def full_spec(a):
        nd = a.ndim
        return pl.BlockSpec(a.shape, lambda n, t, _nd=nd: (0,) * _nd)

    in_specs = [
        # previous tile's halo block (last 4 of its HR rows are used)
        pl.BlockSpec((1, 3, HR * W),
                     lambda n, t: (n, 0, jnp.maximum(t * tpb - 1, 0))),
        # current row tile
        pl.BlockSpec((1, 3, TH * W), lambda n, t: (n, 0, t)),
        # next tile's halo block (first 4 rows are used)
        pl.BlockSpec((1, 3, HR * W),
                     lambda n, t: (n, 0, jnp.minimum((t + 1) * tpb, nHB - 1))),
    ] + [full_spec(a) for a in inputs[3:]]

    ZW = (TH + 8) * W + 2
    IL = (TH + 6) * W

    y = pl.pallas_call(
        _make_kernel(W, TH, nT, HR),
        out_shape=jax.ShapeDtypeStruct((N, 48, H * W), jnp.float32),
        grid=(N, nT),
        in_specs=in_specs,
        out_specs=pl.BlockSpec((1, 48, TH * W), lambda n, t: (n, 0, t)),
        scratch_shapes=[pltpu.VMEM((8, ZW), jnp.bfloat16),    # activation buf A
                        pltpu.VMEM((8, ZW), jnp.bfloat16),    # activation buf B
                        pltpu.VMEM((72, IL), jnp.bfloat16)],  # im2col slab
        compiler_params=pltpu.CompilerParams(
            dimension_semantics=("parallel", "parallel"),
            vmem_limit_bytes=vmem_limit_bytes),
    )(*inputs)

    # PixelShuffle(4): (N, 48, H, W) -> (N, 3, 4H, 4W).  Pure layout glue.
    r = 4
    y = y.reshape(N, 3, r, r, H, W)
    y = jnp.transpose(y, (0, 1, 4, 2, 5, 3))
    return y.reshape(N, 3, H * r, W * r)


# ---------------- pure-JAX reference (mirrors the PyTorch forward) ----------
def _conv_ref(x, w, b):
    y = lax.conv_general_dilated(x, w, (1, 1), "SAME",
                                 dimension_numbers=("NCHW", "OIHW", "NCHW"))
    return y + b[None, :, None, None]


def elsr_x4_ref(x, params):
    w1, b1, w2, b2, alpha, w3, b3, w4, b4 = params
    h = _conv_ref(x, w1, b1)
    u = _conv_ref(h, w2, b2)
    u = jnp.where(u >= 0, u, alpha * u)
    u = _conv_ref(u, w3, b3)
    h = u + h
    h = _conv_ref(h, w4, b4)
    N, C, H, W = h.shape
    r = 4
    h = h.reshape(N, 3, r, r, H, W)
    h = jnp.transpose(h, (0, 1, 4, 2, 5, 3))
    return h.reshape(N, 3, H * r, W * r)


if __name__ == "__main__":
    key = jax.random.PRNGKey(0)
    ks = jax.random.split(key, 10)
    # Deterministic synthetic parameters (shapes from the PyTorch __init__).
    w1 = 0.1 * jax.random.normal(ks[0], (6, 3, 3, 3), jnp.float32)
    b1 = 0.1 * jax.random.normal(ks[1], (6,), jnp.float32)
    w2 = 0.1 * jax.random.normal(ks[2], (6, 6, 3, 3), jnp.float32)
    b2 = 0.1 * jax.random.normal(ks[3], (6,), jnp.float32)
    alpha = jnp.array([0.25], jnp.float32)           # nn.PReLU() default slope
    w3 = 0.1 * jax.random.normal(ks[4], (6, 6, 3, 3), jnp.float32)
    b3 = 0.1 * jax.random.normal(ks[5], (6,), jnp.float32)
    w4 = 0.1 * jax.random.normal(ks[6], (48, 6, 3, 3), jnp.float32)
    b4 = 0.1 * jax.random.normal(ks[7], (48,), jnp.float32)
    params = (w1, b1, w2, b2, alpha, w3, b3, w4, b4)

    # bf16 MXU operands (f32 accumulation) => relaxed tolerance vs f32 reference.
    TOL = dict(rtol=3e-2, atol=3e-2)

    # Case 1: small whole-image tile (nT = 1), batch axis exercised.
    x1 = jax.random.normal(ks[8], (2, 3, 16, 16), jnp.float32)
    out1 = jax.block_until_ready(elsr_x4_forward(x1, params))
    ref1 = jax.block_until_ready(elsr_x4_ref(x1, params))
    assert out1.shape == (2, 3, 64, 64), out1.shape
    np.testing.assert_allclose(np.asarray(out1), np.asarray(ref1), **TOL)

    # Case 2: nT = 3 row tiles -> interior tiles and real prev/next halo staging.
    x2 = jax.random.normal(ks[9], (1, 3, 48, 32), jnp.float32)
    out2 = jax.block_until_ready(elsr_x4_forward(x2, params, row_tile=16))
    ref2 = jax.block_until_ready(elsr_x4_ref(x2, params))
    assert out2.shape == (1, 3, 192, 128), out2.shape
    np.testing.assert_allclose(np.asarray(out2), np.asarray(ref2), **TOL)

    print("KERNEL_OK")
</pallas_src>

<mosaic_0001>
module attributes {stable_mosaic.version = 11 : i64} {
  func.func @kernel(%arg0: i32, %arg1: i32, %arg2: memref<1x3x128xf32, #tpu.memory_space<vmem>>, %arg3: memref<1x3x256xf32, #tpu.memory_space<vmem>>, %arg4: memref<1x3x128xf32, #tpu.memory_space<vmem>>, %arg5: memref<6x72xbf16, #tpu.memory_space<vmem>>, %arg6: memref<6x1xf32, #tpu.memory_space<vmem>>, %arg7: memref<6x72xbf16, #tpu.memory_space<vmem>>, %arg8: memref<6x1xf32, #tpu.memory_space<vmem>>, %arg9: memref<1x1xf32, #tpu.memory_space<vmem>>, %arg10: memref<6x72xbf16, #tpu.memory_space<vmem>>, %arg11: memref<6x1xf32, #tpu.memory_space<vmem>>, %arg12: memref<48x72xbf16, #tpu.memory_space<vmem>>, %arg13: memref<48x1xf32, #tpu.memory_space<vmem>>, %arg14: memref<1x48x256xf32, #tpu.memory_space<vmem>>, %arg15: memref<8x386xbf16, #tpu.memory_space<vmem>>, %arg16: memref<8x386xbf16, #tpu.memory_space<vmem>>, %arg17: memref<72x352xbf16, #tpu.memory_space<vmem>>) attributes {dimension_semantics = [#tpu.dimension_semantics<parallel>, #tpu.dimension_semantics<parallel>], iteration_bounds = array<i64: 2, 1>, scalar_prefetch = 0 : i64, scratch_operands = 3 : i64, tpu.core_type = #tpu.core_type<tc>, window_params = [{transform_indices = @transform_0, window_bounds = array<i64: 1, 3, 128>}, {transform_indices = @transform_1, window_bounds = array<i64: 1, 3, 256>}, {transform_indices = @transform_2, window_bounds = array<i64: 1, 3, 128>}, {pipeline_mode = #tpu.pipeline_mode<synchronous>, transform_indices = @transform_3, window_bounds = array<i64: 6, 72>}, {pipeline_mode = #tpu.pipeline_mode<synchronous>, transform_indices = @transform_4, window_bounds = array<i64: 6, 1>}, {pipeline_mode = #tpu.pipeline_mode<synchronous>, transform_indices = @transform_5, window_bounds = array<i64: 6, 72>}, {pipeline_mode = #tpu.pipeline_mode<synchronous>, transform_indices = @transform_6, window_bounds = array<i64: 6, 1>}, {pipeline_mode = #tpu.pipeline_mode<synchronous>, transform_indices = @transform_7, window_bounds = array<i64: 1, 1>}, {pipeline_mode = #tpu.pipeline_mode<synchronous>, transform_indices = @transform_8, window_bounds = array<i64: 6, 72>}, {pipeline_mode = #tpu.pipeline_mode<synchronous>, transform_indices = @transform_9, window_bounds = array<i64: 6, 1>}, {pipeline_mode = #tpu.pipeline_mode<synchronous>, transform_indices = @transform_10, window_bounds = array<i64: 48, 72>}, {pipeline_mode = #tpu.pipeline_mode<synchronous>, transform_indices = @transform_11, window_bounds = array<i64: 48, 1>}, {transform_indices = @transform_12, window_bounds = array<i64: 1, 48, 256>}]} {
    %0 = tpu.iota {dimensions = array<i32: 1>} : vector<1x352xi32>
    %c16_i32 = arith.constant 16 : i32
    %c0_i32 = arith.constant 0 : i32
    %1 = arith.cmpi eq, %c16_i32, %c0_i32 : i32
    %c1_i32 = arith.constant 1 : i32
    %2 = arith.select %1, %c1_i32, %c16_i32 : i32
    %3 = vector.broadcast %2 : i32 to vector<1x352xi32>
    %4 = arith.remsi %0, %3 : vector<1x352xi32>
    %c0_i32_0 = arith.constant 0 : i32
    %5 = vector.broadcast %c0_i32_0 : i32 to vector<1x352xi32>
    %6 = arith.cmpi ne, %4, %5 : vector<1x352xi32>
    %c0_i32_1 = arith.constant 0 : i32
    %7 = vector.broadcast %c0_i32_1 : i32 to vector<1x352xi32>
    %8 = arith.cmpi slt, %4, %7 : vector<1x352xi32>
    %c0_i32_2 = arith.constant 0 : i32
    %9 = arith.cmpi slt, %2, %c0_i32_2 : i32
    %10 = vector.broadcast %9 : i1 to vector<1x352xi1>
    %11 = vector.broadcast %10 : vector<1x352xi1> to vector<1x352xi1>
    %12 = arith.xori %8, %11 : vector<1x352xi1>
    %13 = arith.andi %12, %6 : vector<1x352xi1>
    %14 = vector.broadcast %2 : i32 to vector<1x352xi32>
    %15 = arith.addi %4, %14 : vector<1x352xi32>
    %16 = arith.select %13, %15, %4 : vector<1x352xi1>, vector<1x352xi32>
    %c0_i32_3 = arith.constant 0 : i32
    %17 = vector.broadcast %c0_i32_3 : i32 to vector<1x352xi32>
    %18 = arith.cmpi ne, %16, %17 : vector<1x352xi32>
    %c15_i32 = arith.constant 15 : i32
    %19 = vector.broadcast %c15_i32 : i32 to vector<1x352xi32>
    %20 = arith.cmpi ne, %16, %19 : vector<1x352xi32>
    %cst = arith.constant 0.000000e+00 : bf16
    %21 = vector.broadcast %cst : bf16 to vector<5x386xbf16>
    %c3 = arith.constant 3 : index
    %c0 = arith.constant 0 : index
    %22 = vector.load %arg15[%c3, %c0] : memref<8x386xbf16, #tpu.memory_space<vmem>>, vector<5x386xbf16>
    tpu.vector_store %arg15[%c3, %c0], %21 {strides = array<i32>} : memref<8x386xbf16, #tpu.memory_space<vmem>>, vector<5x386xbf16>,
    %cst_4 = arith.constant 0.000000e+00 : bf16
    %23 = vector.broadcast %cst_4 : bf16 to vector<2x386xbf16>
    %c6 = arith.constant 6 : index
    %c0_5 = arith.constant 0 : index
    %24 = vector.load %arg16[%c6, %c0_5] : memref<8x386xbf16, #tpu.memory_space<vmem>>, vector<2x386xbf16>
    tpu.vector_store %arg16[%c6, %c0_5], %23 {strides = array<i32>} : memref<8x386xbf16, #tpu.memory_space<vmem>>, vector<2x386xbf16>,
    %cst_6 = arith.constant 0.000000e+00 : bf16
    %25 = vector.broadcast %cst_6 : bf16 to vector<3x1xbf16>
    %c0_7 = arith.constant 0 : index
    %c0_8 = arith.constant 0 : index
    %26 = vector.load %arg15[%c0_7, %c0_8] : memref<8x386xbf16, #tpu.memory_space<vmem>>, vector<3x1xbf16>
    tpu.vector_store %arg15[%c0_7, %c0_8], %25 {strides = array<i32>} : memref<8x386xbf16, #tpu.memory_space<vmem>>, vector<3x1xbf16>,
    %cst_9 = arith.constant 0.000000e+00 : bf16
    %27 = vector.broadcast %cst_9 : bf16 to vector<3x1xbf16>
    %c0_10 = arith.constant 0 : index
    %c385 = arith.constant 385 : index
    %28 = vector.load %arg15[%c0_10, %c385] : memref<8x386xbf16, #tpu.memory_space<vmem>>, vector<3x1xbf16>
    tpu.vector_store %arg15[%c0_10, %c385], %27 {strides = array<i32>} : memref<8x386xbf16, #tpu.memory_space<vmem>>, vector<3x1xbf16>,
    %cst_11 = arith.constant 0.000000e+00 : bf16
    %29 = vector.broadcast %cst_11 : bf16 to vector<6x1xbf16>
    %c0_12 = arith.constant 0 : index
    %c0_13 = arith.constant 0 : index
    %30 = vector.load %arg16[%c0_12, %c0_13] : memref<8x386xbf16, #tpu.memory_space<vmem>>, vector<6x1xbf16>
    tpu.vector_store %arg16[%c0_12, %c0_13], %29 {strides = array<i32>} : memref<8x386xbf16, #tpu.memory_space<vmem>>, vector<6x1xbf16>,
    %cst_14 = arith.constant 0.000000e+00 : bf16
    %31 = vector.broadcast %cst_14 : bf16 to vector<6x1xbf16>
    %c0_15 = arith.constant 0 : index
    %c353 = arith.constant 353 : index
    %32 = vector.load %arg16[%c0_15, %c353] : memref<8x386xbf16, #tpu.memory_space<vmem>>, vector<6x1xbf16>
    tpu.vector_store %arg16[%c0_15, %c353], %31 {strides = array<i32>} : memref<8x386xbf16, #tpu.memory_space<vmem>>, vector<6x1xbf16>,
    %c0_i32_16 = arith.constant 0 : i32
    %33 = arith.cmpi sgt, %arg1, %c0_i32_16 : i32
    %c0_17 = arith.constant 0 : index
    %c0_18 = arith.constant 0 : index
    %c64 = arith.constant 64 : index
    %34 = vector.load %arg2[%c0_17, %c0_18, %c64] : memref<1x3x128xf32, #tpu.memory_space<vmem>>, vector<1x3x64xf32>
    %35 = vector.shape_cast %34 : vector<1x3x64xf32> to vector<3x64xf32>
    %cst_19 = arith.constant 0.000000e+00 : f32
    %36 = vector.broadcast %cst_19 : f32 to vector<3x64xf32>
    %37 = arith.select %33, %35, %36 : vector<3x64xf32>
    %c0_i32_20 = arith.constant 0 : i32
    %38 = arith.cmpi slt, %arg1, %c0_i32_20 : i32
    %c0_21 = arith.constant 0 : index
    %c0_22 = arith.constant 0 : index
    %c0_23 = arith.constant 0 : index
    %39 = vector.load %arg4[%c0_21, %c0_22, %c0_23] : memref<1x3x128xf32, #tpu.memory_space<vmem>>, vector<1x3x64xf32>
    %40 = vector.shape_cast %39 : vector<1x3x64xf32> to vector<3x64xf32>
    %cst_24 = arith.constant 0.000000e+00 : f32
    %41 = vector.broadcast %cst_24 : f32 to vector<3x64xf32>
    %42 = arith.select %38, %40, %41 : vector<3x64xf32>
    %43 = arith.truncf %37 : vector<3x64xf32> to vector<3x64xbf16>
    %c0_25 = arith.constant 0 : index
    %c1 = arith.constant 1 : index
    %44 = vector.load %arg15[%c0_25, %c1] : memref<8x386xbf16, #tpu.memory_space<vmem>>, vector<3x64xbf16>
    tpu.vector_store %arg15[%c0_25, %c1], %43 {strides = array<i32>} : memref<8x386xbf16, #tpu.memory_space<vmem>>, vector<3x64xbf16>,
    %c0_26 = arith.constant 0 : index
    %c0_27 = arith.constant 0 : index
    %c0_28 = arith.constant 0 : index
    %45 = vector.load %arg3[%c0_26, %c0_27, %c0_28] : memref<1x3x256xf32, #tpu.memory_space<vmem>>, vector<1x3x256xf32>
    %46 = vector.shape_cast %45 : vector<1x3x256xf32> to vector<3x256xf32>
    %47 = arith.truncf %46 : vector<3x256xf32> to vector<3x256xbf16>
    %c0_29 = arith.constant 0 : index
    %c65 = arith.constant 65 : index
    %48 = vector.load %arg15[%c0_29, %c65] : memref<8x386xbf16, #tpu.memory_space<vmem>>, vector<3x256xbf16>
    tpu.vector_store %arg15[%c0_29, %c65], %47 {strides = array<i32>} : memref<8x386xbf16, #tpu.memory_space<vmem>>, vector<3x256xbf16>,
    %49 = arith.truncf %42 : vector<3x64xf32> to vector<3x64xbf16>
    %c0_30 = arith.constant 0 : index
    %c321 = arith.constant 321 : index
    %50 = vector.load %arg15[%c0_30, %c321] : memref<8x386xbf16, #tpu.memory_space<vmem>>, vector<3x64xbf16>
    tpu.vector_store %arg15[%c0_30, %c321], %49 {strides = array<i32>} : memref<8x386xbf16, #tpu.memory_space<vmem>>, vector<3x64xbf16>,
    %c0_31 = arith.constant 0 : index
    %c0_32 = arith.constant 0 : index
    %51 = vector.load %arg15[%c0_31, %c0_32] : memref<8x386xbf16, #tpu.memory_space<vmem>>, vector<8x352xbf16>
    %cst_33 = arith.constant 0.000000e+00 : bf16
    %52 = vector.broadcast %cst_33 : bf16 to vector<8x352xbf16>
    %53 = vector.shape_cast %18 : vector<1x352xi1> to vector<1x352xi1>
    %54 = vector.broadcast %53 : vector<1x352xi1> to vector<8x352xi1>
    %55 = arith.select %54, %51, %52 : vector<8x352xi1>, vector<8x352xbf16>
    %c0_34 = arith.constant 0 : index
    %c0_35 = arith.constant 0 : index
    %56 = vector.load %arg17[%c0_34, %c0_35] : memref<72x352xbf16, #tpu.memory_space<vmem>>, vector<8x352xbf16>
    tpu.vector_store %arg17[%c0_34, %c0_35], %55 {strides = array<i32>} : memref<72x352xbf16, #tpu.memory_space<vmem>>, vector<8x352xbf16>,
    %c0_36 = arith.constant 0 : index
    %c1_37 = arith.constant 1 : index
    %57 = vector.load %arg15[%c0_36, %c1_37] : memref<8x386xbf16, #tpu.memory_space<vmem>>, vector<8x352xbf16>
    %c8 = arith.constant 8 : index
    %c0_38 = arith.constant 0 : index
    %58 = vector.load %arg17[%c8, %c0_38] : memref<72x352xbf16, #tpu.memory_space<vmem>>, vector<8x352xbf16>
    tpu.vector_store %arg17[%c8, %c0_38], %57 {strides = array<i32>} : memref<72x352xbf16, #tpu.memory_space<vmem>>, vector<8x352xbf16>,
    %c0_39 = arith.constant 0 : index
    %c2 = arith.constant 2 : index
    %59 = vector.load %arg15[%c0_39, %c2] : memref<8x386xbf16, #tpu.memory_space<vmem>>, vector<8x352xbf16>
    %cst_40 = arith.constant 0.000000e+00 : bf16
    %60 = vector.broadcast %cst_40 : bf16 to vector<8x352xbf16>
    %61 = vector.shape_cast %20 : vector<1x352xi1> to vector<1x352xi1>
    %62 = vector.broadcast %61 : vector<1x352xi1> to vector<8x352xi1>
    %63 = arith.select %62, %59, %60 : vector<8x352xi1>, vector<8x352xbf16>
    %c16 = arith.constant 16 : index
    %c0_41 = arith.constant 0 : index
    %64 = vector.load %arg17[%c16, %c0_41] : memref<72x352xbf16, #tpu.memory_space<vmem>>, vector<8x352xbf16>
    tpu.vector_store %arg17[%c16, %c0_41], %63 {strides = array<i32>} : memref<72x352xbf16, #tpu.memory_space<vmem>>, vector<8x352xbf16>,
    %c0_42 = arith.constant 0 : index
    %c16_43 = arith.constant 16 : index
    %65 = vector.load %arg15[%c0_42, %c16_43] : memref<8x386xbf16, #tpu.memory_space<vmem>>, vector<8x352xbf16>
    %cst_44 = arith.constant 0.000000e+00 : bf16
    %66 = vector.broadcast %cst_44 : bf16 to vector<8x352xbf16>
    %67 = vector.shape_cast %18 : vector<1x352xi1> to vector<1x352xi1>
    %68 = vector.broadcast %67 : vector<1x352xi1> to vector<8x352xi1>
    %69 = arith.select %68, %65, %66 : vector<8x352xi1>, vector<8x352xbf16>
    %c24 = arith.constant 24 : index
    %c0_45 = arith.constant 0 : index
    %70 = vector.load %arg17[%c24, %c0_45] : memref<72x352xbf16, #tpu.memory_space<vmem>>, vector<8x352xbf16>
    tpu.vector_store %arg17[%c24, %c0_45], %69 {strides = array<i32>} : memref<72x352xbf16, #tpu.memory_space<vmem>>, vector<8x352xbf16>,
    %c0_46 = arith.constant 0 : index
    %c17 = arith.constant 17 : index
    %71 = vector.load %arg15[%c0_46, %c17] : memref<8x386xbf16, #tpu.memory_space<vmem>>, vector<8x352xbf16>
    %c32 = arith.constant 32 : index
    %c0_47 = arith.constant 0 : index
    %72 = vector.load %arg17[%c32, %c0_47] : memref<72x352xbf16, #tpu.memory_space<vmem>>, vector<8x352xbf16>
    tpu.vector_store %arg17[%c32, %c0_47], %71 {strides = array<i32>} : memref<72x352xbf16, #tpu.memory_space<vmem>>, vector<8x352xbf16>,
    %c0_48 = arith.constant 0 : index
    %c18 = arith.constant 18 : index
    %73 = vector.load %arg15[%c0_48, %c18] : memref<8x386xbf16, #tpu.memory_space<vmem>>, vector<8x352xbf16>
    %cst_49 = arith.constant 0.000000e+00 : bf16
    %74 = vector.broadcast %cst_49 : bf16 to vector<8x352xbf16>
    %75 = vector.shape_cast %20 : vector<1x352xi1> to vector<1x352xi1>
    %76 = vector.broadcast %75 : vector<1x352xi1> to vector<8x352xi1>
    %77 = arith.select %76, %73, %74 : vector<8x352xi1>, vector<8x352xbf16>
    %c40 = arith.constant 40 : index
    %c0_50 = arith.constant 0 : index
    %78 = vector.load %arg17[%c40, %c0_50] : memref<72x352xbf16, #tpu.memory_space<vmem>>, vector<8x352xbf16>
    tpu.vector_store %arg17[%c40, %c0_50], %77 {strides = array<i32>} : memref<72x352xbf16, #tpu.memory_space<vmem>>, vector<8x352xbf16>,
    %c0_51 = arith.constant 0 : index
    %c32_52 = arith.constant 32 : index
    %79 = vector.load %arg15[%c0_51, %c32_52] : memref<8x386xbf16, #tpu.memory_space<vmem>>, vector<8x352xbf16>
    %cst_53 = arith.constant 0.000000e+00 : bf16
    %80 = vector.broadcast %cst_53 : bf16 to vector<8x352xbf16>
    %81 = vector.shape_cast %18 : vector<1x352xi1> to vector<1x352xi1>
    %82 = vector.broadcast %81 : vector<1x352xi1> to vector<8x352xi1>
    %83 = arith.select %82, %79, %80 : vector<8x352xi1>, vector<8x352xbf16>
    %c48 = arith.constant 48 : index
    %c0_54 = arith.constant 0 : index
    %84 = vector.load %arg17[%c48, %c0_54] : memref<72x352xbf16, #tpu.memory_space<vmem>>, vector<8x352xbf16>
    tpu.vector_store %arg17[%c48, %c0_54], %83 {strides = array<i32>} : memref<72x352xbf16, #tpu.memory_space<vmem>>, vector<8x352xbf16>,
    %c0_55 = arith.constant 0 : index
    %c33 = arith.constant 33 : index
    %85 = vector.load %arg15[%c0_55, %c33] : memref<8x386xbf16, #tpu.memory_space<vmem>>, vector<8x352xbf16>
    %c56 = arith.constant 56 : index
    %c0_56 = arith.constant 0 : index
    %86 = vector.load %arg17[%c56, %c0_56] : memref<72x352xbf16, #tpu.memory_space<vmem>>, vector<8x352xbf16>
    tpu.vector_store %arg17[%c56, %c0_56], %85 {strides = array<i32>} : memref<72x352xbf16, #tpu.memory_space<vmem>>, vector<8x352xbf16>,
    %c0_57 = arith.constant 0 : index
    %c34 = arith.constant 34 : index
    %87 = vector.load %arg15[%c0_57, %c34] : memref<8x386xbf16, #tpu.memory_space<vmem>>, vector<8x352xbf16>
    %cst_58 = arith.constant 0.000000e+00 : bf16
    %88 = vector.broadcast %cst_58 : bf16 to vector<8x352xbf16>
    %89 = vector.shape_cast %20 : vector<1x352xi1> to vector<1x352xi1>
    %90 = vector.broadcast %89 : vector<1x352xi1> to vector<8x352xi1>
    %91 = arith.select %90, %87, %88 : vector<8x352xi1>, vector<8x352xbf16>
    %c64_59 = arith.constant 64 : index
    %c0_60 = arith.constant 0 : index
    %92 = vector.load %arg17[%c64_59, %c0_60] : memref<72x352xbf16, #tpu.memory_space<vmem>>, vector<8x352xbf16>
    tpu.vector_store %arg17[%c64_59, %c0_60], %91 {strides = array<i32>} : memref<72x352xbf16, #tpu.memory_space<vmem>>, vector<8x352xbf16>,
    %c0_61 = arith.constant 0 : index
    %c0_62 = arith.constant 0 : index
    %93 = vector.load %arg5[%c0_61, %c0_62] : memref<6x72xbf16, #tpu.memory_space<vmem>>, vector<6x72xbf16>
    %c0_63 = arith.constant 0 : index
    %c0_64 = arith.constant 0 : index
    %94 = vector.load %arg17[%c0_63, %c0_64] : memref<72x352xbf16, #tpu.memory_space<vmem>>, vector<72x352xbf16>
    %cst_65 = arith.constant dense<0.000000e+00> : vector<6x352xf32>
    %95 = tpu.matmul %93, %94, %cst_65 {dimension_numbers = #tpu.dot_dimension_numbers<[1], [0], [0], [1], [0, 0, 1, 1], [], []>} : vector<6x72xbf16>, vector<72x352xbf16>, vector<6x352xf32> -> vector<6x352xf32>
    %c0_66 = arith.constant 0 : index
    %c0_67 = arith.constant 0 : index
    %96 = vector.load %arg6[%c0_66, %c0_67] : memref<6x1xf32, #tpu.memory_space<vmem>>, vector<6x1xf32>
    %97 = vector.broadcast %96 : vector<6x1xf32> to vector<6x352xf32>
    %98 = arith.addf %95, %97 : vector<6x352xf32>
    %99 = arith.truncf %98 : vector<6x352xf32> to vector<6x352xbf16>
    %c0_68 = arith.constant 0 : index
    %c1_69 = arith.constant 1 : index
    %100 = vector.load %arg16[%c0_68, %c1_69] : memref<8x386xbf16, #tpu.memory_space<vmem>>, vector<6x352xbf16>
    tpu.vector_store %arg16[%c0_68, %c1_69], %99 {strides = array<i32>} : memref<8x386xbf16, #tpu.memory_space<vmem>>, vector<6x352xbf16>,
    %c0_i32_70 = arith.constant 0 : i32
    %101 = arith.cmpi eq, %arg1, %c0_i32_70 : i32
    %102 = arith.extui %101 : i1 to i32
    %c0_i32_71 = arith.constant 0 : i32
    %103 = arith.cmpi ne, %102, %c0_i32_71 : i32
    scf.if %103 {
      %cst_241 = arith.constant 0.000000e+00 : bf16
      %298 = vector.broadcast %cst_241 : bf16 to vector<6x48xbf16>
      %c0_242 = arith.constant 0 : index
      %c1_243 = arith.constant 1 : index
      %299 = vector.load %arg16[%c0_242, %c1_243] : memref<8x386xbf16, #tpu.memory_space<vmem>>, vector<6x48xbf16>
      tpu.vector_store %arg16[%c0_242, %c1_243], %298 {strides = array<i32>} : memref<8x386xbf16, #tpu.memory_space<vmem>>, vector<6x48xbf16>,
    } else {
    }
    %c0_i32_72 = arith.constant 0 : i32
    %104 = arith.cmpi eq, %arg1, %c0_i32_72 : i32
    %105 = arith.extui %104 : i1 to i32
    %c0_i32_73 = arith.constant 0 : i32
    %106 = arith.cmpi ne, %105, %c0_i32_73 : i32
    scf.if %106 {
      %cst_241 = arith.constant 0.000000e+00 : bf16
      %298 = vector.broadcast %cst_241 : bf16 to vector<6x48xbf16>
      %c0_242 = arith.constant 0 : index
      %c305 = arith.constant 305 : index
      %299 = vector.load %arg16[%c0_242, %c305] : memref<8x386xbf16, #tpu.memory_space<vmem>>, vector<6x48xbf16>
      tpu.vector_store %arg16[%c0_242, %c305], %298 {strides = array<i32>} : memref<8x386xbf16, #tpu.memory_space<vmem>>, vector<6x48xbf16>,
    } else {
    }
    %c0_74 = arith.constant 0 : index
    %c0_75 = arith.constant 0 : index
    %107 = vector.load %arg16[%c0_74, %c0_75] : memref<8x386xbf16, #tpu.memory_space<vmem>>, vector<8x320xbf16>
    %108 = vector.extract_strided_slice %18 {offsets = [0, 0], sizes = [1, 320], strides = [1, 1]} : vector<1x352xi1> to vector<1x320xi1>
    %cst_76 = arith.constant 0.000000e+00 : bf16
    %109 = vector.broadcast %cst_76 : bf16 to vector<8x320xbf16>
    %110 = vector.shape_cast %108 : vector<1x320xi1> to vector<1x320xi1>
    %111 = vector.broadcast %110 : vector<1x320xi1> to vector<8x320xi1>
    %112 = arith.select %111, %107, %109 : vector<8x320xi1>, vector<8x320xbf16>
    %c0_77 = arith.constant 0 : index
    %c0_78 = arith.constant 0 : index
    %113 = vector.load %arg17[%c0_77, %c0_78] : memref<72x352xbf16, #tpu.memory_space<vmem>>, vector<8x320xbf16>
    tpu.vector_store %arg17[%c0_77, %c0_78], %112 {strides = array<i32>} : memref<72x352xbf16, #tpu.memory_space<vmem>>, vector<8x320xbf16>,
    %c0_79 = arith.constant 0 : index
    %c1_80 = arith.constant 1 : index
    %114 = vector.load %arg16[%c0_79, %c1_80] : memref<8x386xbf16, #tpu.memory_space<vmem>>, vector<8x320xbf16>
    %c8_81 = arith.constant 8 : index
    %c0_82 = arith.constant 0 : index
    %115 = vector.load %arg17[%c8_81, %c0_82] : memref<72x352xbf16, #tpu.memory_space<vmem>>, vector<8x320xbf16>
    tpu.vector_store %arg17[%c8_81, %c0_82], %114 {strides = array<i32>} : memref<72x352xbf16, #tpu.memory_space<vmem>>, vector<8x320xbf16>,
    %c0_83 = arith.constant 0 : index
    %c2_84 = arith.constant 2 : index
    %116 = vector.load %arg16[%c0_83, %c2_84] : memref<8x386xbf16, #tpu.memory_space<vmem>>, vector<8x320xbf16>
    %117 = vector.extract_strided_slice %20 {offsets = [0, 0], sizes = [1, 320], strides = [1, 1]} : vector<1x352xi1> to vector<1x320xi1>
    %cst_85 = arith.constant 0.000000e+00 : bf16
    %118 = vector.broadcast %cst_85 : bf16 to vector<8x320xbf16>
    %119 = vector.shape_cast %117 : vector<1x320xi1> to vector<1x320xi1>
    %120 = vector.broadcast %119 : vector<1x320xi1> to vector<8x320xi1>
    %121 = arith.select %120, %116, %118 : vector<8x320xi1>, vector<8x320xbf16>
    %c16_86 = arith.constant 16 : index
    %c0_87 = arith.constant 0 : index
    %122 = vector.load %arg17[%c16_86, %c0_87] : memref<72x352xbf16, #tpu.memory_space<vmem>>, vector<8x320xbf16>
    tpu.vector_store %arg17[%c16_86, %c0_87], %121 {strides = array<i32>} : memref<72x352xbf16, #tpu.memory_space<vmem>>, vector<8x320xbf16>,
    %c0_88 = arith.constant 0 : index
    %c16_89 = arith.constant 16 : index
    %123 = vector.load %arg16[%c0_88, %c16_89] : memref<8x386xbf16, #tpu.memory_space<vmem>>, vector<8x320xbf16>
    %124 = vector.extract_strided_slice %18 {offsets = [0, 0], sizes = [1, 320], strides = [1, 1]} : vector<1x352xi1> to vector<1x320xi1>
    %cst_90 = arith.constant 0.000000e+00 : bf16
    %125 = vector.broadcast %cst_90 : bf16 to vector<8x320xbf16>
    %126 = vector.shape_cast %124 : vector<1x320xi1> to vector<1x320xi1>
    %127 = vector.broadcast %126 : vector<1x320xi1> to vector<8x320xi1>
    %128 = arith.select %127, %123, %125 : vector<8x320xi1>, vector<8x320xbf16>
    %c24_91 = arith.constant 24 : index
    %c0_92 = arith.constant 0 : index
    %129 = vector.load %arg17[%c24_91, %c0_92] : memref<72x352xbf16, #tpu.memory_space<vmem>>, vector<8x320xbf16>
    tpu.vector_store %arg17[%c24_91, %c0_92], %128 {strides = array<i32>} : memref<72x352xbf16, #tpu.memory_space<vmem>>, vector<8x320xbf16>,
    %c0_93 = arith.constant 0 : index
    %c17_94 = arith.constant 17 : index
    %130 = vector.load %arg16[%c0_93, %c17_94] : memref<8x386xbf16, #tpu.memory_space<vmem>>, vector<8x320xbf16>
    %c32_95 = arith.constant 32 : index
    %c0_96 = arith.constant 0 : index
    %131 = vector.load %arg17[%c32_95, %c0_96] : memref<72x352xbf16, #tpu.memory_space<vmem>>, vector<8x320xbf16>
    tpu.vector_store %arg17[%c32_95, %c0_96], %130 {strides = array<i32>} : memref<72x352xbf16, #tpu.memory_space<vmem>>, vector<8x320xbf16>,
    %c0_97 = arith.constant 0 : index
    %c18_98 = arith.constant 18 : index
    %132 = vector.load %arg16[%c0_97, %c18_98] : memref<8x386xbf16, #tpu.memory_space<vmem>>, vector<8x320xbf16>
    %133 = vector.extract_strided_slice %20 {offsets = [0, 0], sizes = [1, 320], strides = [1, 1]} : vector<1x352xi1> to vector<1x320xi1>
    %cst_99 = arith.constant 0.000000e+00 : bf16
    %134 = vector.broadcast %cst_99 : bf16 to vector<8x320xbf16>
    %135 = vector.shape_cast %133 : vector<1x320xi1> to vector<1x320xi1>
    %136 = vector.broadcast %135 : vector<1x320xi1> to vector<8x320xi1>
    %137 = arith.select %136, %132, %134 : vector<8x320xi1>, vector<8x320xbf16>
    %c40_100 = arith.constant 40 : index
    %c0_101 = arith.constant 0 : index
    %138 = vector.load %arg17[%c40_100, %c0_101] : memref<72x352xbf16, #tpu.memory_space<vmem>>, vector<8x320xbf16>
    tpu.vector_store %arg17[%c40_100, %c0_101], %137 {strides = array<i32>} : memref<72x352xbf16, #tpu.memory_space<vmem>>, vector<8x320xbf16>,
    %c0_102 = arith.constant 0 : index
    %c32_103 = arith.constant 32 : index
    %139 = vector.load %arg16[%c0_102, %c32_103] : memref<8x386xbf16, #tpu.memory_space<vmem>>, vector<8x320xbf16>
    %140 = vector.extract_strided_slice %18 {offsets = [0, 0], sizes = [1, 320], strides = [1, 1]} : vector<1x352xi1> to vector<1x320xi1>
    %cst_104 = arith.constant 0.000000e+00 : bf16
    %141 = vector.broadcast %cst_104 : bf16 to vector<8x320xbf16>
    %142 = vector.shape_cast %140 : vector<1x320xi1> to vector<1x320xi1>
    %143 = vector.broadcast %142 : vector<1x320xi1> to vector<8x320xi1>
    %144 = arith.select %143, %139, %141 : vector<8x320xi1>, vector<8x320xbf16>
    %c48_105 = arith.constant 48 : index
    %c0_106 = arith.constant 0 : index
    %145 = vector.load %arg17[%c48_105, %c0_106] : memref<72x352xbf16, #tpu.memory_space<vmem>>, vector<8x320xbf16>
    tpu.vector_store %arg17[%c48_105, %c0_106], %144 {strides = array<i32>} : memref<72x352xbf16, #tpu.memory_space<vmem>>, vector<8x320xbf16>,
    %c0_107 = arith.constant 0 : index
    %c33_108 = arith.constant 33 : index
    %146 = vector.load %arg16[%c0_107, %c33_108] : memref<8x386xbf16, #tpu.memory_space<vmem>>, vector<8x320xbf16>
    %c56_109 = arith.constant 56 : index
    %c0_110 = arith.constant 0 : index
    %147 = vector.load %arg17[%c56_109, %c0_110] : memref<72x352xbf16, #tpu.memory_space<vmem>>, vector<8x320xbf16>
    tpu.vector_store %arg17[%c56_109, %c0_110], %146 {strides = array<i32>} : memref<72x352xbf16, #tpu.memory_space<vmem>>, vector<8x320xbf16>,
    %c0_111 = arith.constant 0 : index
    %c34_112 = arith.constant 34 : index
    %148 = vector.load %arg16[%c0_111, %c34_112] : memref<8x386xbf16, #tpu.memory_space<vmem>>, vector<8x320xbf16>
    %149 = vector.extract_strided_slice %20 {offsets = [0, 0], sizes = [1, 320], strides = [1, 1]} : vector<1x352xi1> to vector<1x320xi1>
    %cst_113 = arith.constant 0.000000e+00 : bf16
    %150 = vector.broadcast %cst_113 : bf16 to vector<8x320xbf16>
    %151 = vector.shape_cast %149 : vector<1x320xi1> to vector<1x320xi1>
    %152 = vector.broadcast %151 : vector<1x320xi1> to vector<8x320xi1>
    %153 = arith.select %152, %148, %150 : vector<8x320xi1>, vector<8x320xbf16>
    %c64_114 = arith.constant 64 : index
    %c0_115 = arith.constant 0 : index
    %154 = vector.load %arg17[%c64_114, %c0_115] : memref<72x352xbf16, #tpu.memory_space<vmem>>, vector<8x320xbf16>
    tpu.vector_store %arg17[%c64_114, %c0_115], %153 {strides = array<i32>} : memref<72x352xbf16, #tpu.memory_space<vmem>>, vector<8x320xbf16>,
    %c0_116 = arith.constant 0 : index
    %c0_117 = arith.constant 0 : index
    %155 = vector.load %arg7[%c0_116, %c0_117] : memref<6x72xbf16, #tpu.memory_space<vmem>>, vector<6x72xbf16>
    %c0_118 = arith.constant 0 : index
    %c0_119 = arith.constant 0 : index
    %156 = vector.load %arg17[%c0_118, %c0_119] : memref<72x352xbf16, #tpu.memory_space<vmem>>, vector<72x320xbf16>
    %cst_120 = arith.constant dense<0.000000e+00> : vector<6x320xf32>
    %157 = tpu.matmul %155, %156, %cst_120 {dimension_numbers = #tpu.dot_dimension_numbers<[1], [0], [0], [1], [0, 0, 1, 1], [], []>} : vector<6x72xbf16>, vector<72x320xbf16>, vector<6x320xf32> -> vector<6x320xf32>
    %c0_121 = arith.constant 0 : index
    %c0_122 = arith.constant 0 : index
    %158 = vector.load %arg8[%c0_121, %c0_122] : memref<6x1xf32, #tpu.memory_space<vmem>>, vector<6x1xf32>
    %159 = vector.broadcast %158 : vector<6x1xf32> to vector<6x320xf32>
    %160 = arith.addf %157, %159 : vector<6x320xf32>
    %c0_123 = arith.constant 0 : index
    %c0_124 = arith.constant 0 : index
    %161 = vector.load %arg9[%c0_123, %c0_124] : memref<1x1xf32, #tpu.memory_space<vmem>>, vector<1x1xf32>
    %162 = vector.extract %161[0, 0] : f32 from vector<1x1xf32>
    %cst_125 = arith.constant 0.000000e+00 : f32
    %163 = vector.broadcast %cst_125 : f32 to vector<6x320xf32>
    %164 = arith.cmpf oge, %160, %163 : vector<6x320xf32>
    %165 = vector.broadcast %162 : f32 to vector<6x320xf32>
    %166 = arith.mulf %165, %160 : vector<6x320xf32>
    %167 = arith.select %164, %160, %166 : vector<6x320xi1>, vector<6x320xf32>
    %168 = arith.truncf %167 : vector<6x320xf32> to vector<6x320xbf16>
    %c0_126 = arith.constant 0 : index
    %c1_127 = arith.constant 1 : index
    %169 = vector.load %arg15[%c0_126, %c1_127] : memref<8x386xbf16, #tpu.memory_space<vmem>>, vector<6x320xbf16>
    tpu.vector_store %arg15[%c0_126, %c1_127], %168 {strides = array<i32>} : memref<8x386xbf16, #tpu.memory_space<vmem>>, vector<6x320xbf16>,
    %c0_i32_128 = arith.constant 0 : i32
    %170 = arith.cmpi eq, %arg1, %c0_i32_128 : i32
    %171 = arith.extui %170 : i1 to i32
    %c0_i32_129 = arith.constant 0 : i32
    %172 = arith.cmpi ne, %171, %c0_i32_129 : i32
    scf.if %172 {
      %cst_241 = arith.constant 0.000000e+00 : bf16
      %298 = vector.broadcast %cst_241 : bf16 to vector<6x32xbf16>
      %c0_242 = arith.constant 0 : index
      %c1_243 = arith.constant 1 : index
      %299 = vector.load %arg15[%c0_242, %c1_243] : memref<8x386xbf16, #tpu.memory_space<vmem>>, vector<6x32xbf16>
      tpu.vector_store %arg15[%c0_242, %c1_243], %298 {strides = array<i32>} : memref<8x386xbf16, #tpu.memory_space<vmem>>, vector<6x32xbf16>,
    } else {
    }
    %c0_i32_130 = arith.constant 0 : i32
    %173 = arith.cmpi eq, %arg1, %c0_i32_130 : i32
    %174 = arith.extui %173 : i1 to i32
    %c0_i32_131 = arith.constant 0 : i32
    %175 = arith.cmpi ne, %174, %c0_i32_131 : i32
    scf.if %175 {
      %cst_241 = arith.constant 0.000000e+00 : bf16
      %298 = vector.broadcast %cst_241 : bf16 to vector<6x32xbf16>
      %c0_242 = arith.constant 0 : index
      %c289 = arith.constant 289 : index
      %299 = vector.load %arg15[%c0_242, %c289] : memref<8x386xbf16, #tpu.memory_space<vmem>>, vector<6x32xbf16>
      tpu.vector_store %arg15[%c0_242, %c289], %298 {strides = array<i32>} : memref<8x386xbf16, #tpu.memory_space<vmem>>, vector<6x32xbf16>,
    } else {
    }
    %c0_132 = arith.constant 0 : index
    %c0_133 = arith.constant 0 : index
    %176 = vector.load %arg15[%c0_132, %c0_133] : memref<8x386xbf16, #tpu.memory_space<vmem>>, vector<8x288xbf16>
    %177 = vector.extract_strided_slice %18 {offsets = [0, 0], sizes = [1, 288], strides = [1, 1]} : vector<1x352xi1> to vector<1x288xi1>
    %cst_134 = arith.constant 0.000000e+00 : bf16
    %178 = vector.broadcast %cst_134 : bf16 to vector<8x288xbf16>
    %179 = vector.shape_cast %177 : vector<1x288xi1> to vector<1x288xi1>
    %180 = vector.broadcast %179 : vector<1x288xi1> to vector<8x288xi1>
    %181 = arith.select %180, %176, %178 : vector<8x288xi1>, vector<8x288xbf16>
    %c0_135 = arith.constant 0 : index
    %c0_136 = arith.constant 0 : index
    %182 = vector.load %arg17[%c0_135, %c0_136] : memref<72x352xbf16, #tpu.memory_space<vmem>>, vector<8x288xbf16>
    tpu.vector_store %arg17[%c0_135, %c0_136], %181 {strides = array<i32>} : memref<72x352xbf16, #tpu.memory_space<vmem>>, vector<8x288xbf16>,
    %c0_137 = arith.constant 0 : index
    %c1_138 = arith.constant 1 : index
    %183 = vector.load %arg15[%c0_137, %c1_138] : memref<8x386xbf16, #tpu.memory_space<vmem>>, vector<8x288xbf16>
    %c8_139 = arith.constant 8 : index
    %c0_140 = arith.constant 0 : index
    %184 = vector.load %arg17[%c8_139, %c0_140] : memref<72x352xbf16, #tpu.memory_space<vmem>>, vector<8x288xbf16>
    tpu.vector_store %arg17[%c8_139, %c0_140], %183 {strides = array<i32>} : memref<72x352xbf16, #tpu.memory_space<vmem>>, vector<8x288xbf16>,
    %c0_141 = arith.constant 0 : index
    %c2_142 = arith.constant 2 : index
    %185 = vector.load %arg15[%c0_141, %c2_142] : memref<8x386xbf16, #tpu.memory_space<vmem>>, vector<8x288xbf16>
    %186 = vector.extract_strided_slice %20 {offsets = [0, 0], sizes = [1, 288], strides = [1, 1]} : vector<1x352xi1> to vector<1x288xi1>
    %cst_143 = arith.constant 0.000000e+00 : bf16
    %187 = vector.broadcast %cst_143 : bf16 to vector<8x288xbf16>
    %188 = vector.shape_cast %186 : vector<1x288xi1> to vector<1x288xi1>
    %189 = vector.broadcast %188 : vector<1x288xi1> to vector<8x288xi1>
    %190 = arith.select %189, %185, %187 : vector<8x288xi1>, vector<8x288xbf16>
    %c16_144 = arith.constant 16 : index
    %c0_145 = arith.constant 0 : index
    %191 = vector.load %arg17[%c16_144, %c0_145] : memref<72x352xbf16, #tpu.memory_space<vmem>>, vector<8x288xbf16>
    tpu.vector_store %arg17[%c16_144, %c0_145], %190 {strides = array<i32>} : memref<72x352xbf16, #tpu.memory_space<vmem>>, vector<8x288xbf16>,
    %c0_146 = arith.constant 0 : index
    %c16_147 = arith.constant 16 : index
    %192 = vector.load %arg15[%c0_146, %c16_147] : memref<8x386xbf16, #tpu.memory_space<vmem>>, vector<8x288xbf16>
    %193 = vector.extract_strided_slice %18 {offsets = [0, 0], sizes = [1, 288], strides = [1, 1]} : vector<1x352xi1> to vector<1x288xi1>
    %cst_148 = arith.constant 0.000000e+00 : bf16
    %194 = vector.broadcast %cst_148 : bf16 to vector<8x288xbf16>
    %195 = vector.shape_cast %193 : vector<1x288xi1> to vector<1x288xi1>
    %196 = vector.broadcast %195 : vector<1x288xi1> to vector<8x288xi1>
    %197 = arith.select %196, %192, %194 : vector<8x288xi1>, vector<8x288xbf16>
    %c24_149 = arith.constant 24 : index
    %c0_150 = arith.constant 0 : index
    %198 = vector.load %arg17[%c24_149, %c0_150] : memref<72x352xbf16, #tpu.memory_space<vmem>>, vector<8x288xbf16>
    tpu.vector_store %arg17[%c24_149, %c0_150], %197 {strides = array<i32>} : memref<72x352xbf16, #tpu.memory_space<vmem>>, vector<8x288xbf16>,
    %c0_151 = arith.constant 0 : index
    %c17_152 = arith.constant 17 : index
    %199 = vector.load %arg15[%c0_151, %c17_152] : memref<8x386xbf16, #tpu.memory_space<vmem>>, vector<8x288xbf16>
    %c32_153 = arith.constant 32 : index
    %c0_154 = arith.constant 0 : index
    %200 = vector.load %arg17[%c32_153, %c0_154] : memref<72x352xbf16, #tpu.memory_space<vmem>>, vector<8x288xbf16>
    tpu.vector_store %arg17[%c32_153, %c0_154], %199 {strides = array<i32>} : memref<72x352xbf16, #tpu.memory_space<vmem>>, vector<8x288xbf16>,
    %c0_155 = arith.constant 0 : index
    %c18_156 = arith.constant 18 : index
    %201 = vector.load %arg15[%c0_155, %c18_156] : memref<8x386xbf16, #tpu.memory_space<vmem>>, vector<8x288xbf16>
    %202 = vector.extract_strided_slice %20 {offsets = [0, 0], sizes = [1, 288], strides = [1, 1]} : vector<1x352xi1> to vector<1x288xi1>
    %cst_157 = arith.constant 0.000000e+00 : bf16
    %203 = vector.broadcast %cst_157 : bf16 to vector<8x288xbf16>
    %204 = vector.shape_cast %202 : vector<1x288xi1> to vector<1x288xi1>
    %205 = vector.broadcast %204 : vector<1x288xi1> to vector<8x288xi1>
    %206 = arith.select %205, %201, %203 : vector<8x288xi1>, vector<8x288xbf16>
    %c40_158 = arith.constant 40 : index
    %c0_159 = arith.constant 0 : index
    %207 = vector.load %arg17[%c40_158, %c0_159] : memref<72x352xbf16, #tpu.memory_space<vmem>>, vector<8x288xbf16>
    tpu.vector_store %arg17[%c40_158, %c0_159], %206 {strides = array<i32>} : memref<72x352xbf16, #tpu.memory_space<vmem>>, vector<8x288xbf16>,
    %c0_160 = arith.constant 0 : index
    %c32_161 = arith.constant 32 : index
    %208 = vector.load %arg15[%c0_160, %c32_161] : memref<8x386xbf16, #tpu.memory_space<vmem>>, vector<8x288xbf16>
    %209 = vector.extract_strided_slice %18 {offsets = [0, 0], sizes = [1, 288], strides = [1, 1]} : vector<1x352xi1> to vector<1x288xi1>
    %cst_162 = arith.constant 0.000000e+00 : bf16
    %210 = vector.broadcast %cst_162 : bf16 to vector<8x288xbf16>
    %211 = vector.shape_cast %209 : vector<1x288xi1> to vector<1x288xi1>
    %212 = vector.broadcast %211 : vector<1x288xi1> to vector<8x288xi1>
    %213 = arith.select %212, %208, %210 : vector<8x288xi1>, vector<8x288xbf16>
    %c48_163 = arith.constant 48 : index
    %c0_164 = arith.constant 0 : index
    %214 = vector.load %arg17[%c48_163, %c0_164] : memref<72x352xbf16, #tpu.memory_space<vmem>>, vector<8x288xbf16>
    tpu.vector_store %arg17[%c48_163, %c0_164], %213 {strides = array<i32>} : memref<72x352xbf16, #tpu.memory_space<vmem>>, vector<8x288xbf16>,
    %c0_165 = arith.constant 0 : index
    %c33_166 = arith.constant 33 : index
    %215 = vector.load %arg15[%c0_165, %c33_166] : memref<8x386xbf16, #tpu.memory_space<vmem>>, vector<8x288xbf16>
    %c56_167 = arith.constant 56 : index
    %c0_168 = arith.constant 0 : index
    %216 = vector.load %arg17[%c56_167, %c0_168] : memref<72x352xbf16, #tpu.memory_space<vmem>>, vector<8x288xbf16>
    tpu.vector_store %arg17[%c56_167, %c0_168], %215 {strides = array<i32>} : memref<72x352xbf16, #tpu.memory_space<vmem>>, vector<8x288xbf16>,
    %c0_169 = arith.constant 0 : index
    %c34_170 = arith.constant 34 : index
    %217 = vector.load %arg15[%c0_169, %c34_170] : memref<8x386xbf16, #tpu.memory_space<vmem>>, vector<8x288xbf16>
    %218 = vector.extract_strided_slice %20 {offsets = [0, 0], sizes = [1, 288], strides = [1, 1]} : vector<1x352xi1> to vector<1x288xi1>
    %cst_171 = arith.constant 0.000000e+00 : bf16
    %219 = vector.broadcast %cst_171 : bf16 to vector<8x288xbf16>
    %220 = vector.shape_cast %218 : vector<1x288xi1> to vector<1x288xi1>
    %221 = vector.broadcast %220 : vector<1x288xi1> to vector<8x288xi1>
    %222 = arith.select %221, %217, %219 : vector<8x288xi1>, vector<8x288xbf16>
    %c64_172 = arith.constant 64 : index
    %c0_173 = arith.constant 0 : index
    %223 = vector.load %arg17[%c64_172, %c0_173] : memref<72x352xbf16, #tpu.memory_space<vmem>>, vector<8x288xbf16>
    tpu.vector_store %arg17[%c64_172, %c0_173], %222 {strides = array<i32>} : memref<72x352xbf16, #tpu.memory_space<vmem>>, vector<8x288xbf16>,
    %c0_174 = arith.constant 0 : index
    %c0_175 = arith.constant 0 : index
    %224 = vector.load %arg10[%c0_174, %c0_175] : memref<6x72xbf16, #tpu.memory_space<vmem>>, vector<6x72xbf16>
    %c0_176 = arith.constant 0 : index
    %c0_177 = arith.constant 0 : index
    %225 = vector.load %arg17[%c0_176, %c0_177] : memref<72x352xbf16, #tpu.memory_space<vmem>>, vector<72x288xbf16>
    %cst_178 = arith.constant dense<0.000000e+00> : vector<6x288xf32>
    %226 = tpu.matmul %224, %225, %cst_178 {dimension_numbers = #tpu.dot_dimension_numbers<[1], [0], [0], [1], [0, 0, 1, 1], [], []>} : vector<6x72xbf16>, vector<72x288xbf16>, vector<6x288xf32> -> vector<6x288xf32>
    %c0_179 = arith.constant 0 : index
    %c0_180 = arith.constant 0 : index
    %227 = vector.load %arg11[%c0_179, %c0_180] : memref<6x1xf32, #tpu.memory_space<vmem>>, vector<6x1xf32>
    %228 = vector.broadcast %227 : vector<6x1xf32> to vector<6x288xf32>
    %229 = arith.addf %226, %228 : vector<6x288xf32>
    %c0_181 = arith.constant 0 : index
    %c33_182 = arith.constant 33 : index
    %230 = vector.load %arg16[%c0_181, %c33_182] : memref<8x386xbf16, #tpu.memory_space<vmem>>, vector<6x288xbf16>
    %231 = arith.extf %230 : vector<6x288xbf16> to vector<6x288xf32>
    %232 = arith.addf %229, %231 : vector<6x288xf32>
    %233 = arith.truncf %232 : vector<6x288xf32> to vector<6x288xbf16>
    %c0_183 = arith.constant 0 : index
    %c1_184 = arith.constant 1 : index
    %234 = vector.load %arg15[%c0_183, %c1_184] : memref<8x386xbf16, #tpu.memory_space<vmem>>, vector<6x288xbf16>
    tpu.vector_store %arg15[%c0_183, %c1_184], %233 {strides = array<i32>} : memref<8x386xbf16, #tpu.memory_space<vmem>>, vector<6x288xbf16>,
    %c0_i32_185 = arith.constant 0 : i32
    %235 = arith.cmpi eq, %arg1, %c0_i32_185 : i32
    %236 = arith.extui %235 : i1 to i32
    %c0_i32_186 = arith.constant 0 : i32
    %237 = arith.cmpi ne, %236, %c0_i32_186 : i32
    scf.if %237 {
      %cst_241 = arith.constant 0.000000e+00 : bf16
      %298 = vector.broadcast %cst_241 : bf16 to vector<6x16xbf16>
      %c0_242 = arith.constant 0 : index
      %c1_243 = arith.constant 1 : index
      %299 = vector.load %arg15[%c0_242, %c1_243] : memref<8x386xbf16, #tpu.memory_space<vmem>>, vector<6x16xbf16>
      tpu.vector_store %arg15[%c0_242, %c1_243], %298 {strides = array<i32>} : memref<8x386xbf16, #tpu.memory_space<vmem>>, vector<6x16xbf16>,
    } else {
    }
    %c0_i32_187 = arith.constant 0 : i32
    %238 = arith.cmpi eq, %arg1, %c0_i32_187 : i32
    %239 = arith.extui %238 : i1 to i32
    %c0_i32_188 = arith.constant 0 : i32
    %240 = arith.cmpi ne, %239, %c0_i32_188 : i32
    scf.if %240 {
      %cst_241 = arith.constant 0.000000e+00 : bf16
      %298 = vector.broadcast %cst_241 : bf16 to vector<6x16xbf16>
      %c0_242 = arith.constant 0 : index
      %c273 = arith.constant 273 : index
      %299 = vector.load %arg15[%c0_242, %c273] : memref<8x386xbf16, #tpu.memory_space<vmem>>, vector<6x16xbf16>
      tpu.vector_store %arg15[%c0_242, %c273], %298 {strides = array<i32>} : memref<8x386xbf16, #tpu.memory_space<vmem>>, vector<6x16xbf16>,
    } else {
    }
    %c0_189 = arith.constant 0 : index
    %c0_190 = arith.constant 0 : index
    %241 = vector.load %arg15[%c0_189, %c0_190] : memref<8x386xbf16, #tpu.memory_space<vmem>>, vector<8x256xbf16>
    %242 = vector.extract_strided_slice %18 {offsets = [0, 0], sizes = [1, 256], strides = [1, 1]} : vector<1x352xi1> to vector<1x256xi1>
    %cst_191 = arith.constant 0.000000e+00 : bf16
    %243 = vector.broadcast %cst_191 : bf16 to vector<8x256xbf16>
    %244 = vector.shape_cast %242 : vector<1x256xi1> to vector<1x256xi1>
    %245 = vector.broadcast %244 : vector<1x256xi1> to vector<8x256xi1>
    %246 = arith.select %245, %241, %243 : vector<8x256xi1>, vector<8x256xbf16>
    %c0_192 = arith.constant 0 : index
    %c0_193 = arith.constant 0 : index
    %247 = vector.load %arg17[%c0_192, %c0_193] : memref<72x352xbf16, #tpu.memory_space<vmem>>, vector<8x256xbf16>
    tpu.vector_store %arg17[%c0_192, %c0_193], %246 {strides = array<i32>} : memref<72x352xbf16, #tpu.memory_space<vmem>>, vector<8x256xbf16>,
    %c0_194 = arith.constant 0 : index
    %c1_195 = arith.constant 1 : index
    %248 = vector.load %arg15[%c0_194, %c1_195] : memref<8x386xbf16, #tpu.memory_space<vmem>>, vector<8x256xbf16>
    %c8_196 = arith.constant 8 : index
    %c0_197 = arith.constant 0 : index
    %249 = vector.load %arg17[%c8_196, %c0_197] : memref<72x352xbf16, #tpu.memory_space<vmem>>, vector<8x256xbf16>
    tpu.vector_store %arg17[%c8_196, %c0_197], %248 {strides = array<i32>} : memref<72x352xbf16, #tpu.memory_space<vmem>>, vector<8x256xbf16>,
    %c0_198 = arith.constant 0 : index
    %c2_199 = arith.constant 2 : index
    %250 = vector.load %arg15[%c0_198, %c2_199] : memref<8x386xbf16, #tpu.memory_space<vmem>>, vector<8x256xbf16>
    %251 = vector.extract_strided_slice %20 {offsets = [0, 0], sizes = [1, 256], strides = [1, 1]} : vector<1x352xi1> to vector<1x256xi1>
    %cst_200 = arith.constant 0.000000e+00 : bf16
    %252 = vector.broadcast %cst_200 : bf16 to vector<8x256xbf16>
    %253 = vector.shape_cast %251 : vector<1x256xi1> to vector<1x256xi1>
    %254 = vector.broadcast %253 : vector<1x256xi1> to vector<8x256xi1>
    %255 = arith.select %254, %250, %252 : vector<8x256xi1>, vector<8x256xbf16>
    %c16_201 = arith.constant 16 : index
    %c0_202 = arith.constant 0 : index
    %256 = vector.load %arg17[%c16_201, %c0_202] : memref<72x352xbf16, #tpu.memory_space<vmem>>, vector<8x256xbf16>
    tpu.vector_store %arg17[%c16_201, %c0_202], %255 {strides = array<i32>} : memref<72x352xbf16, #tpu.memory_space<vmem>>, vector<8x256xbf16>,
    %c0_203 = arith.constant 0 : index
    %c16_204 = arith.constant 16 : index
    %257 = vector.load %arg15[%c0_203, %c16_204] : memref<8x386xbf16, #tpu.memory_space<vmem>>, vector<8x256xbf16>
    %258 = vector.extract_strided_slice %18 {offsets = [0, 0], sizes = [1, 256], strides = [1, 1]} : vector<1x352xi1> to vector<1x256xi1>
    %cst_205 = arith.constant 0.000000e+00 : bf16
    %259 = vector.broadcast %cst_205 : bf16 to vector<8x256xbf16>
    %260 = vector.shape_cast %258 : vector<1x256xi1> to vector<1x256xi1>
    %261 = vector.broadcast %260 : vector<1x256xi1> to vector<8x256xi1>
    %262 = arith.select %261, %257, %259 : vector<8x256xi1>, vector<8x256xbf16>
    %c24_206 = arith.constant 24 : index
    %c0_207 = arith.constant 0 : index
    %263 = vector.load %arg17[%c24_206, %c0_207] : memref<72x352xbf16, #tpu.memory_space<vmem>>, vector<8x256xbf16>
    tpu.vector_store %arg17[%c24_206, %c0_207], %262 {strides = array<i32>} : memref<72x352xbf16, #tpu.memory_space<vmem>>, vector<8x256xbf16>,
    %c0_208 = arith.constant 0 : index
    %c17_209 = arith.constant 17 : index
    %264 = vector.load %arg15[%c0_208, %c17_209] : memref<8x386xbf16, #tpu.memory_space<vmem>>, vector<8x256xbf16>
    %c32_210 = arith.constant 32 : index
    %c0_211 = arith.constant 0 : index
    %265 = vector.load %arg17[%c32_210, %c0_211] : memref<72x352xbf16, #tpu.memory_space<vmem>>, vector<8x256xbf16>
    tpu.vector_store %arg17[%c32_210, %c0_211], %264 {strides = array<i32>} : memref<72x352xbf16, #tpu.memory_space<vmem>>, vector<8x256xbf16>,
    %c0_212 = arith.constant 0 : index
    %c18_213 = arith.constant 18 : index
    %266 = vector.load %arg15[%c0_212, %c18_213] : memref<8x386xbf16, #tpu.memory_space<vmem>>, vector<8x256xbf16>
    %267 = vector.extract_strided_slice %20 {offsets = [0, 0], sizes = [1, 256], strides = [1, 1]} : vector<1x352xi1> to vector<1x256xi1>
    %cst_214 = arith.constant 0.000000e+00 : bf16
    %268 = vector.broadcast %cst_214 : bf16 to vector<8x256xbf16>
    %269 = vector.shape_cast %267 : vector<1x256xi1> to vector<1x256xi1>
    %270 = vector.broadcast %269 : vector<1x256xi1> to vector<8x256xi1>
    %271 = arith.select %270, %266, %268 : vector<8x256xi1>, vector<8x256xbf16>
    %c40_215 = arith.constant 40 : index
    %c0_216 = arith.constant 0 : index
    %272 = vector.load %arg17[%c40_215, %c0_216] : memref<72x352xbf16, #tpu.memory_space<vmem>>, vector<8x256xbf16>
    tpu.vector_store %arg17[%c40_215, %c0_216], %271 {strides = array<i32>} : memref<72x352xbf16, #tpu.memory_space<vmem>>, vector<8x256xbf16>,
    %c0_217 = arith.constant 0 : index
    %c32_218 = arith.constant 32 : index
    %273 = vector.load %arg15[%c0_217, %c32_218] : memref<8x386xbf16, #tpu.memory_space<vmem>>, vector<8x256xbf16>
    %274 = vector.extract_strided_slice %18 {offsets = [0, 0], sizes = [1, 256], strides = [1, 1]} : vector<1x352xi1> to vector<1x256xi1>
    %cst_219 = arith.constant 0.000000e+00 : bf16
    %275 = vector.broadcast %cst_219 : bf16 to vector<8x256xbf16>
    %276 = vector.shape_cast %274 : vector<1x256xi1> to vector<1x256xi1>
    %277 = vector.broadcast %276 : vector<1x256xi1> to vector<8x256xi1>
    %278 = arith.select %277, %273, %275 : vector<8x256xi1>, vector<8x256xbf16>
    %c48_220 = arith.constant 48 : index
    %c0_221 = arith.constant 0 : index
    %279 = vector.load %arg17[%c48_220, %c0_221] : memref<72x352xbf16, #tpu.memory_space<vmem>>, vector<8x256xbf16>
    tpu.vector_store %arg17[%c48_220, %c0_221], %278 {strides = array<i32>} : memref<72x352xbf16, #tpu.memory_space<vmem>>, vector<8x256xbf16>,
    %c0_222 = arith.constant 0 : index
    %c33_223 = arith.constant 33 : index
    %280 = vector.load %arg15[%c0_222, %c33_223] : memref<8x386xbf16, #tpu.memory_space<vmem>>, vector<8x256xbf16>
    %c56_224 = arith.constant 56 : index
    %c0_225 = arith.constant 0 : index
    %281 = vector.load %arg17[%c56_224, %c0_225] : memref<72x352xbf16, #tpu.memory_space<vmem>>, vector<8x256xbf16>
    tpu.vector_store %arg17[%c56_224, %c0_225], %280 {strides = array<i32>} : memref<72x352xbf16, #tpu.memory_space<vmem>>, vector<8x256xbf16>,
    %c0_226 = arith.constant 0 : index
    %c34_227 = arith.constant 34 : index
    %282 = vector.load %arg15[%c0_226, %c34_227] : memref<8x386xbf16, #tpu.memory_space<vmem>>, vector<8x256xbf16>
    %283 = vector.extract_strided_slice %20 {offsets = [0, 0], sizes = [1, 256], strides = [1, 1]} : vector<1x352xi1> to vector<1x256xi1>
    %cst_228 = arith.constant 0.000000e+00 : bf16
    %284 = vector.broadcast %cst_228 : bf16 to vector<8x256xbf16>
    %285 = vector.shape_cast %283 : vector<1x256xi1> to vector<1x256xi1>
    %286 = vector.broadcast %285 : vector<1x256xi1> to vector<8x256xi1>
    %287 = arith.select %286, %282, %284 : vector<8x256xi1>, vector<8x256xbf16>
    %c64_229 = arith.constant 64 : index
    %c0_230 = arith.constant 0 : index
    %288 = vector.load %arg17[%c64_229, %c0_230] : memref<72x352xbf16, #tpu.memory_space<vmem>>, vector<8x256xbf16>
    tpu.vector_store %arg17[%c64_229, %c0_230], %287 {strides = array<i32>} : memref<72x352xbf16, #tpu.memory_space<vmem>>, vector<8x256xbf16>,
    %c0_231 = arith.constant 0 : index
    %c0_232 = arith.constant 0 : index
    %289 = vector.load %arg12[%c0_231, %c0_232] : memref<48x72xbf16, #tpu.memory_space<vmem>>, vector<48x72xbf16>
    %c0_233 = arith.constant 0 : index
    %c0_234 = arith.constant 0 : index
    %290 = vector.load %arg17[%c0_233, %c0_234] : memref<72x352xbf16, #tpu.memory_space<vmem>>, vector<72x256xbf16>
    %cst_235 = arith.constant dense<0.000000e+00> : vector<48x256xf32>
    %291 = tpu.matmul %289, %290, %cst_235 {dimension_numbers = #tpu.dot_dimension_numbers<[1], [0], [0], [1], [0, 0, 1, 1], [], []>} : vector<48x72xbf16>, vector<72x256xbf16>, vector<48x256xf32> -> vector<48x256xf32>
    %c0_236 = arith.constant 0 : index
    %c0_237 = arith.constant 0 : index
    %292 = vector.load %arg13[%c0_236, %c0_237] : memref<48x1xf32, #tpu.memory_space<vmem>>, vector<48x1xf32>
    %293 = vector.broadcast %292 : vector<48x1xf32> to vector<48x256xf32>
    %294 = arith.addf %291, %293 : vector<48x256xf32>
    %c0_238 = arith.constant 0 : index
    %c0_239 = arith.constant 0 : index
    %c0_240 = arith.constant 0 : index
    %295 = vector.load %arg14[%c0_238, %c0_239, %c0_240] : memref<1x48x256xf32, #tpu.memory_space<vmem>>, vector<1x48x256xf32>
    %296 = vector.shape_cast %295 : vector<1x48x256xf32> to vector<48x256xf32>
    %297 = vector.shape_cast %294 : vector<48x256xf32> to vector<1x48x256xf32>
    tpu.vector_store %arg14[%c0_238, %c0_239, %c0_240], %297 {strides = array<i32>} : memref<1x48x256xf32, #tpu.memory_space<vmem>>, vector<1x48x256xf32>,
    return
  }
  func.func @transform_0(%arg0: i32, %arg1: i32) -> (i32, i32, i32) {
    %c2_i32 = arith.constant 2 : i32
    %0 = arith.muli %arg1, %c2_i32 : i32
    %c1_i32 = arith.constant 1 : i32
    %1 = arith.subi %0, %c1_i32 : i32
    %c0_i32 = arith.constant 0 : i32
    %2 = arith.maxsi %1, %c0_i32 : i32
    %c0_i32_0 = arith.constant 0 : i32
    %c0_i32_1 = arith.constant 0 : i32
    return %arg0, %c0_i32_0, %2 : i32, i32, i32
  }
  func.func @transform_1(%arg0: i32, %arg1: i32) -> (i32, i32, i32) {
    %c0_i32 = arith.constant 0 : i32
    %c0_i32_0 = arith.constant 0 : i32
    return %arg0, %c0_i32, %arg1 : i32, i32, i32
  }
  func.func @transform_2(%arg0: i32, %arg1: i32) -> (i32, i32, i32) {
    %c1_i32 = arith.constant 1 : i32
    %0 = arith.addi %arg1, %c1_i32 : i32
    %c2_i32 = arith.constant 2 : i32
    %1 = arith.muli %0, %c2_i32 : i32
    %c1_i32_0 = arith.constant 1 : i32
    %2 = arith.minsi %1, %c1_i32_0 : i32
    %c0_i32 = arith.constant 0 : i32
    %c0_i32_1 = arith.constant 0 : i32
    return %arg0, %c0_i32, %2 : i32, i32, i32
  }
  func.func @transform_3(%arg0: i32, %arg1: i32) -> (i32, i32) {
    %c0_i32 = arith.constant 0 : i32
    %c0_i32_0 = arith.constant 0 : i32
    %c0_i32_1 = arith.constant 0 : i32
    return %c0_i32, %c0_i32_0 : i32, i32
  }
  func.func @transform_4(%arg0: i32, %arg1: i32) -> (i32, i32) {
    %c0_i32 = arith.constant 0 : i32
    %c0_i32_0 = arith.constant 0 : i32
    %c0_i32_1 = arith.constant 0 : i32
    return %c0_i32, %c0_i32_0 : i32, i32
  }
  func.func @transform_5(%arg0: i32, %arg1: i32) -> (i32, i32) {
    %c0_i32 = arith.constant 0 : i32
    %c0_i32_0 = arith.constant 0 : i32
    %c0_i32_1 = arith.constant 0 : i32
    return %c0_i32, %c0_i32_0 : i32, i32
  }
  func.func @transform_6(%arg0: i32, %arg1: i32) -> (i32, i32) {
    %c0_i32 = arith.constant 0 : i32
    %c0_i32_0 = arith.constant 0 : i32
    %c0_i32_1 = arith.constant 0 : i32
    return %c0_i32, %c0_i32_0 : i32, i32
  }
  func.func @transform_7(%arg0: i32, %arg1: i32) -> (i32, i32) {
    %c0_i32 = arith.constant 0 : i32
    %c0_i32_0 = arith.constant 0 : i32
    %c0_i32_1 = arith.constant 0 : i32
    return %c0_i32, %c0_i32_0 : i32, i32
  }
  func.func @transform_8(%arg0: i32, %arg1: i32) -> (i32, i32) {
    %c0_i32 = arith.constant 0 : i32
    %c0_i32_0 = arith.constant 0 : i32
    %c0_i32_1 = arith.constant 0 : i32
    return %c0_i32, %c0_i32_0 : i32, i32
  }
  func.func @transform_9(%arg0: i32, %arg1: i32) -> (i32, i32) {
    %c0_i32 = arith.constant 0 : i32
    %c0_i32_0 = arith.constant 0 : i32
    %c0_i32_1 = arith.constant 0 : i32
    return %c0_i32, %c0_i32_0 : i32, i32
  }
  func.func @transform_10(%arg0: i32, %arg1: i32) -> (i32, i32) {
    %c0_i32 = arith.constant 0 : i32
    %c0_i32_0 = arith.constant 0 : i32
    %c0_i32_1 = arith.constant 0 : i32
    return %c0_i32, %c0_i32_0 : i32, i32
  }
  func.func @transform_11(%arg0: i32, %arg1: i32) -> (i32, i32) {
    %c0_i32 = arith.constant 0 : i32
    %c0_i32_0 = arith.constant 0 : i32
    %c0_i32_1 = arith.constant 0 : i32
    return %c0_i32, %c0_i32_0 : i32, i32
  }
  func.func @transform_12(%arg0: i32, %arg1: i32) -> (i32, i32, i32) {
    %c0_i32 = arith.constant 0 : i32
    %c0_i32_0 = arith.constant 0 : i32
    return %arg0, %c0_i32, %arg1 : i32, i32, i32
  }
}

</mosaic_0001>

<bundles_post_ra>
// kernel: tpu_custom_call.1
= control target key start
LH: loop header
LB: loop body
LE: loop exit
PB: predicated region body
PF: predicated region fallthrough
CT: control target
= control target key end

     0   :  { %s3483_s0 = inlined_call_operand.vmem [shape: f32[2,3,256], index: 0, kind: input, shape index: {}]   ;;  %s3484_s1 = inlined_call_operand.vmem [shape: f32[2,3,256], index: 1, kind: input, shape index: {}]   ;;  %s3485_s2 = inlined_call_operand.vmem [shape: f32[2,3,256], index: 2, kind: input, shape index: {}]   ;;  %s3486_s3 = inlined_call_operand.vmem [shape: bf16[6,72], index: 3, kind: input, shape index: {}]   ;;  %s3487_s4 = inlined_call_operand.vmem [shape: f32[6,1], index: 4, kind: input, shape index: {}]   ;;  %s3488_s5 = inlined_call_operand.vmem [shape: bf16[6,72], index: 5, kind: input, shape index: {}]   ;;  %s3489_s6 = inlined_call_operand.vmem [shape: f32[6,1], index: 6, kind: input, shape index: {}]   ;;  %s3490_s7 = inlined_call_operand.<no memory space> [shape: f32[1,1], index: 7, kind: input, shape index: {}]   ;;  %s3491_s8 = inlined_call_operand.vmem [shape: bf16[6,72], index: 8, kind: input, shape index: {}]   ;;  %s3492_s9 = inlined_call_operand.vmem [shape: f32[6,1], index: 9, kind: input, shape index: {}]   ;;  %s3493_s10 = inlined_call_operand.vmem [shape: bf16[48,72], index: 10, kind: input, shape index: {}]   ;;  %s3494_s11 = inlined_call_operand.vmem [shape: f32[48,1], index: 11, kind: input, shape index: {}]   ;;  %s3495_s12 = inlined_call_operand.hbm [shape: f32[2,48,256], index: 12, kind: output, shape index: {}]  }
   0x1   :  { %v17_v0 = vstv %s3490_s7 }
   0x2   :  { %18 = vst [vmem:[#allocation5] sm:$0x1] %v17_v0 }
   0x3   :  { %19 = vsyncpa [#allocation7], 0 }
   0x4   :  { %21 = vsyncpa [#allocation7 + $0x1], 0  ;;  %s2842_s21 = smov 0   ;;  %s2844_s22 = smov 0  }
   0x5   :  { %s2846_s23 = smov 0   ;;  %s2848_s24 = smov 0  }
   0x6   :  { %s2850_s25 = smov 0   ;;  %s2852_s26 = smov 0  }
   0x7 LB: > { %s2403_s7 = sadd.s32 4294967295, %s2751_s26   ;;  %s2404_s27 = sadd.s32 4294967294, %s2751_s26   ;;  %s2751_s26 = sphi %s2852_s26, %s27_s26   ;;  %s2747_s25 = sphi %s2850_s25, %s3603_s25   ;;  %s2743_s24 = sphi %s2848_s24, %s3602_s24   ;;  %s2739_s23 = sphi %s2846_s23, %s3601_s23   ;;  %s2735_s22 = sphi %s2844_s22, %s3600_s22   ;;  %s2731_s21 = sphi %s2842_s21, %s3599_s21  }
   0x8   : > { %s39_s0 = sadd.s32 1, %s2747_s25  ;;  %s337_s28 = sadd.s32 1, %s2739_s23 }
   0x9   : > { %p41_p0 = scmp.ge.s32.totalorder %s39_s0, 2  ;;  %p347_p1 = scmp.ne.s32.totalorder %s2739_s23, %s2735_s22 }
   0xa   : > { %p348_p2 = scmp.eq.s32.totalorder %s2403_s7, 1  ;;  %p353_p3 = scmp.ne.s32.totalorder %s2735_s22, %s2731_s21 }
   0xb   : > { %s3605_s0 = smov (%p41_p0, %s39_s0), 0  ;;  %p354_p5 = scmp.eq.s32.totalorder %s2404_s27, 1 }
   0xc   : > { %p2882_p4 = por %p348_p2, %p347_p1  ;;  %s332_s30 = ssub.s32 %s2747_s25, %s3605_s0 }
   0xd   : > { %p2407_p6 = scmp.ge.s32.totalorder %s2751_s26, 1  ;;  %p335_p7 = scmp.eq.s32.totalorder %s332_s30, 0 }
   0xe   : > { %p2889_p8 = por %p354_p5, %p353_p3  ;;  %p450_p9 = scmp.lt.s32.totalorder %s2751_s26, 3 }
   0xf   : > { %s2895_s13 = scalar_select %p335_p7, %s2739_s23, %s337_s28  }
  0x10   : > { %p451_p10 = pnand %p2407_p6, %p450_p9 }
  0x11   : > { %p537_p11 = scmp.lt.s32.totalorder (!%p451_p10), %s2743_s24, 1  ;;  %v566_v1 = vlaneseq (!%p451_p10)  ;;  %v2753_v2 = vmov (!%p451_p10), 0.0|0.0   ;;  %v2754_v4 = vmov (!%p451_p10), 0   ;;  %vm612_vm0 = vcmask (!%p451_p10), 1043457   ;;  %v625_v7 = vld [vmem:[#allocation2 + $0x8] sm:$0xee] (!%p451_p10) }
  0x12   : > { %454 = sbr.rel (%p451_p10) target bundleno = 2089 (0x829), region = 68  ;;  %v2414_v3 = vcombine.low (!%p451_p10), %v2753_v2, %v2753_v2  ;;  %628 = vst [vmem:[#allocation3] sm:$0x88] (!%p451_p10), %v2754_v4  ;;  %vm613_vm1 = vsmask.f32 (!%p451_p10), 7942  ;;  %vm622_vm2 = vcmask (!%p451_p10), 15365   ;;  %1090 = vmatprep.mubr.bf16.mxu1 (!%p451_p10), %v2754_v4  ;;  %2647 = vset.pattern.permute.xlu1 (!%p451_p10), %v2754_v4 }
  0x13   : > { %v567_v5 = vand.u32 (!%p451_p10), 127, %v566_v1  ;;  %vm2902_vm3 = vmand (!%p451_p10), %vm612_vm0, %vm613_vm1  ;;  %vm616_vm4 = vsmask.f32 (!%p451_p10), 7958  ;;  %1462 = vmatprep.mubr.bf16.mxu0 (!%p451_p10), %v2754_v4  ;;  %2648 = vset.pattern.permute.xlu0 (!%p451_p10), %v2754_v4  ;;  %s2755_s15 = smov (!%p451_p10), 65   ;;  %vm634_vm8 = vsmask.f32 (!%p451_p10), 1280 }
  0x14   : > { %708 = vrot.lane.b32.xlu1 (!%p451_p10), %v2414_v3, %s2755_s15  ;;  %vm623_vm5 = vmand (!%p451_p10), %vm622_vm2, %vm616_vm4  ;;  %vm639_vm11 = vcmask (!%p451_p10), 9224   ;;  %s2756_s20 = smov (!%p451_p10), 2   ;;  %v619_v23 = vld [vmem:[#allocation2] sm:$0xee] (!%p451_p10)  ;;  %s3510_s7 = smov (!%p451_p10), 16  }
  0x15   : > { %v568_v8 = vadd.s32 (!%p451_p10), 128, %v567_v5  ;;  %v574_v9 = vand.u32 (!%p451_p10), 15, %v567_v5  ;;  %v569_v10 = vadd.s32 (!%p451_p10), 256, %v567_v5  ;;  %vm624_vm6 = vmor (!%p451_p10), %vm623_vm5, %vm2902_vm3  ;;  %vm615_vm5 = vcmask (!%p451_p10), 1047557   ;;  %s2758_s27 = smov (!%p451_p10), 18   ;;  %s2759_s28 = smov (!%p451_p10), 32  }
  0x16   : > { %v626_v11 = vsel (!%p451_p10), %vm624_vm6, 0, %v625_v7  ;;  %vm640_vm0 = vmand (!%p451_p10), %vm639_vm11, %vm634_vm8  ;;  %s2760_s30 = smov (!%p451_p10), 34   ;;  %vm667_vm11 = vcmask (!%p451_p10), 525320   ;;  %s2764_s17 = smov (!%p451_p10), 126  }
  0x17   : > { %v581_v13 = vand.u32 (!%p451_p10), 15, %v568_v8  ;;  %vm609_vm7 = vcmp.ne.s32.totalorder (!%p451_p10), %v574_v9, 15  ;;  %v588_v14 = vand.u32 (!%p451_p10), 15, %v569_v10  ;;  %627 = vst [vmem:[#allocation2 + $0x8] sm:$0xee] (!%p451_p10), %v626_v11  ;;  %vm606_vm12 = vcmp.ne.s32.totalorder (!%p451_p10), %v574_v9, 0 }
  0x18   : > { %s2765_s18 = smov (!%p451_p10), 112  }
  0x19   : > { %s538_s14 = scalar_select %p537_p11, %s2743_s24, 1  ;;  %vm610_vm9 = vcmp.ne.s32.totalorder %v581_v13, 15  ;;  %vm611_vm10 = vcmp.ne.s32.totalorder %v588_v14, 15  ;;  %vm607_vm14 = vcmp.ne.s32.totalorder %v581_v13, 0  ;;  %vm608_vm1 = vcmp.ne.s32.totalorder %v588_v14, 0 }
  0x1a   : > { %vm760_vm13 = vmpackc.low %vm610_vm9, %vm609_vm7 }
  0x1b   : > { %s2498_s16 = sshll.u32 %s538_s14, 3  ;;  %v762_v17 = vsel %vm760_vm13, 65537, %v2754_v4  ;;  %vm761_vm15 = vmpackc.low %vm611_vm10, %vm611_vm10  ;;  %vm633_vm10 = vcmask 1024   ;;  %vm690_vm13 = vcmask 1041928   ;;  %s2761_s14 = smov 127  }
  0x1c   : > { %s544_s19 = scalar_lea.vmem %s3484_s1, %s2498_s16  ;;  %764 = vrot.lane.b32.xlu1 %v762_v17, %s2756_s20  ;;  %v763_v18 = vsel %vm761_vm15, 65537, %v2754_v4  ;;  %vm2919_vm2 = vmpackc.low %vm607_vm14, %vm606_vm12  ;;  %vm693_vm15 = vsmask.f32 5376  ;;  %s2763_s16 = smov 95  }
  0x1d   : > { %v672_v12 = vld [vmem:[%s544_s19] sm:$0x77]  ;;  %vm2924_vm6 = vmpackc.low %vm608_vm1, %vm608_vm1  ;;  %v793_v24 = vsel %vm2919_vm2, 65537, %v2754_v4  ;;  %s2766_s19 = smov 110  }
  0x1e   : > { %v674_v15 = vcombine.high %v672_v12, %v672_v12  ;;  %v641_v20 = vld [vmem:[#allocation2 + $0xc] sm:$0x3]  ;;  %vm617_vm7 = vmand %vm615_vm5, %vm616_vm4  ;;  %v794_v26 = vsel %vm2924_vm6, 65537, %v2754_v4  ;;  %v701_v30 = vld [vmem:[#allocation2 + $0x8] sm:$0x3]  ;;  %vm692_vm5 = vcmask 1045508  }
  0x1f   : > { %v642_v21 = vsel %vm640_vm0, 0, %v641_v20  ;;  %vm618_vm9 = vmor %vm617_vm7, %vm2902_vm3  ;;  %vm699_vm3 = vcmask 525312   ;;  %vm713_vm0 = vcmask 5124  }
  0x20   : > { %v2501_v16 = vpack.c.bf16 %v674_v15, %v672_v12  ;;  %766 = vrot.lane.b32.xlu1 %v763_v18, %s2756_s20  ;;  %643 = vst [vmem:[#allocation2 + $0xc] sm:$0x3] %v642_v21  ;;  %v620_v25 = vsel %vm618_vm9, 0, %v619_v23  ;;  %vm635_vm4 = vmand %vm633_vm10, %vm634_vm8  ;;  %vm686_vm9 = vcmask 531456   ;;  %s2767_s20 = smov 96  }
  0x21   : > { %621 = vst [vmem:[#allocation2] sm:$0xee] %v620_v25  ;;  %vm700_vm12 = vmand %vm699_vm3, %vm634_vm8 }
  0x22   : > { %683 = vrot.lane.b32.xlu0 %v2501_v16, %s2755_s15  ;;  %vm668_vm14 = vmand %vm667_vm11, %vm634_vm8  ;;  %vm732_vm11 = vcmask 781312  }
  0x23   : > { %vm2943_vm1 = vmand %vm690_vm13, %vm634_vm8  ;;  %vm769_vm8 = vcmask 15360   ;;  %vm800_vm13 = vcmask 130048  }
  0x24   : > { %841 = vrot.lane.b32.xlu1 %v762_v17, %s2758_s27  ;;  %vm714_vm7 = vmand %vm713_vm0, %vm693_vm15  ;;  %vm846_vm0 = vcmask 146432  }
  0x25   : > { %vm694_vm10 = vmand %vm692_vm5, %vm693_vm15 }
  0x26   : > { %664 = vrot.lane.b32.xlu0 %v2414_v3, %s2755_s15  ;;  %vm695_vm3 = vmor %vm694_vm10, %vm2943_vm1  ;;  %s2762_s15 = smov 111  }
  0x28   : > { %870 = vrot.lane.b32.xlu1 %v793_v24, %s2759_s28  ;;  %v636_v27 = vld [vmem:[#allocation2] sm:$0x3] }
  0x29   : > { %v637_v28 = vsel %vm635_vm4, 0, %v636_v27  ;;  %vm715_vm4 = vmor %vm714_vm7, %vm2943_vm1  ;;  %vm875_vm7 = vcmask 261120  }
  0x2a   : > { %795 = vrot.lane.b32.xlu0 %v793_v24, %s3510_s7  ;;  %638 = vst [vmem:[#allocation2] sm:$0x3] %v637_v28 }
  0x2c   : > { %917 = vrot.lane.b32.xlu1 %v762_v17, %s2760_s30 }
  0x2e   : > { %797 = vrot.lane.b32.xlu0 %v794_v26, %s3510_s7 }
  0x31   : > { %v669_v34 = vld [vmem:[#allocation2] sm:$0x3] }
  0x32   : > { %843 = vrot.lane.b32.xlu0 %v763_v18, %s2758_s27  ;;  %s3512_s27 = smov 94  }
  0x36   : > { %872 = vrot.lane.b32.xlu0 %v794_v26, %s2759_s28  ;;  %s2771_s28 = smov 1  }
  0x3a   : > { %919 = vrot.lane.b32.xlu0 %v763_v18, %s2760_s30  ;;  %s2571_s30 = smul.u32 1536, %s2743_s24 }
  0x86   : > { %v709_v29 = vpop.permute.xlu1 %708 }
  0x87   : > { %v710_v38 = vrot.slane %v709_v29, 4 }
  0x89   : > { %v711_v43 = vsel %vm686_vm9, %v710_v38, %v709_v29 }
  0x8e   : > { %v765_v32 = vpop.permute.xlu1 %764 }
  0x8f   : > { %v2958_v55 = vrot.slane %v765_v32, 4 }
  0x91   : > { %v2985_v1 = vsel %vm769_vm8, %v2958_v55, %v765_v32  ;;  %v966_v32 = vld [vmem:[%s3487_s4] sm:$0x3f] }
  0x92   : > { %v767_v37 = vpop.permute.xlu1 %766  ;;  %vm772_vm15 = vcmp.ne.s16.totalorder %v2985_v1, 0 }
  0x93   : > { %v2976_v63 = vsel %vm769_vm8, %v2958_v55, %v767_v37 }
  0x94   : > { %v684_v31 = vpop.permute.xlu0 %683 }
  0x95   : > { %v685_v33 = vrot.slane %v684_v31, 4 }
  0x96   : > { %v2947_v42 = vpop.permute.xlu1 %841 }
  0x97   : > { %v702_v35 = vsel %vm700_vm12, %v685_v33, %v701_v30  ;;  %v687_v47 = vsel %vm686_vm9, %v685_v33, %v684_v31  ;;  %vm923_vm12 = vcmask 277504   ;;  %v2990_v5 = vrot.slane %v2947_v42, 4 }
  0x98   : > { %703 = vst [vmem:[#allocation2 + $0x8] sm:$0x3] %v702_v35  ;;  %v665_v36 = vpop.permute.xlu0 %664  ;;  %vm3508_vm9 = vcmask 1043456  }
  0x99   : > { %v670_v40 = vsel %vm668_vm14, %v665_v36, %v669_v34  ;;  %vm773_vm14 = vcmp.ne.s16.totalorder %v2976_v63, 0  ;;  %v3018_v14 = vsel %vm846_vm0, %v2990_v5, %v2947_v42 }
  0x9a   : > { %671 = vst [vmem:[#allocation2] sm:$0x3] %v670_v40  ;;  %v2953_v50 = vpop.permute.xlu1 %870 }
  0x9b   : > { %v3006_v10 = vrot.slane %v2953_v50, 4 }
  0x9c   : > { %v796_v41 = vpop.permute.xlu0 %795 }
  0x9d   : > { %v2978_v0 = vrot.slane %v796_v41, 4  ;;  %v3036_v21 = vsel %vm875_vm7, %v3006_v10, %v2953_v50 }
  0x9e   : > { %v2955_v52 = vpop.permute.xlu1 %917  ;;  %vm878_vm8 = vcmp.ne.s16.totalorder %v3036_v21, 0  ;;  %v2087_v21 = vld [vmem:[%s3494_s11 + $0x8] sm:$0xff] }
  0x9f   : > { %v716_v44 = vld [vmem:[#allocation2 + $0x8] sm:$0x33]  ;;  %v2963_v57 = vrot.slane %v2955_v52, 4  ;;  %v2999_v7 = vsel %vm800_vm13, %v2978_v0, %v796_v41 }
  0xa0   : > { %v717_v45 = vsel %vm715_vm4, %v711_v43, %v716_v44  ;;  %v798_v46 = vpop.permute.xlu0 %797  ;;  %vm803_vm5 = vcmp.ne.s16.totalorder %v2999_v7, 0  ;;  %vm849_vm4 = vcmp.ne.s16.totalorder %v3018_v14, 0 }
  0xa1   : > { %718 = vst [vmem:[#allocation2 + $0x8] sm:$0x33] %v717_v45  ;;  %v696_v48 = vld [vmem:[#allocation2] sm:$0x33]  ;;  %v2993_v6 = vsel %vm800_vm13, %v2978_v0, %v798_v46  ;;  %v3051_v27 = vsel %vm923_vm12, %v2963_v57, %v2955_v52 }
  0xa2   : > { %v697_v49 = vsel %vm695_vm3, %v687_v47, %v696_v48  ;;  %vm3509_vm1 = vcmp.ne.s16.totalorder %v2993_v6, 0 }
  0xa3   : > { %698 = vst [vmem:[#allocation2] sm:$0x33] %v697_v49 }
  0xa4   : > { %v844_v51 = vpop.permute.xlu0 %843 }
  0xa5   : > { %v3009_v11 = vsel %vm846_vm0, %v2990_v5, %v844_v51  ;;  %vm927_vm0 = vcmp.ne.s16.totalorder %v3051_v27, 0  ;;  %v2089_v27 = vld [vmem:[%s3494_s11 + $0x18] sm:$0xff] }
  0xa6   : > { %vm3498_vm10 = vcmp.ne.s16.totalorder %v3009_v11, 0 }
  0xa8   : > { %v873_v53 = vpop.permute.xlu0 %872  ;;  %v735_v54 = vld [vmem:[#allocation2 + $0x8] sm:$0xf] }
  0xa9   : > { %740 = vrot.lane.b32.xlu0 %v735_v54, %s2761_s14  ;;  %v823_v59 = vld [vmem:[#allocation2 + $0x8] sm:$0xf]  ;;  %v3025_v17 = vsel %vm875_vm7, %v3006_v10, %v873_v53  ;;  %vm3503_vm7 = vcmask 777216  }
  0xaa   : > { %v2960_v56 = vld [vmem:[#allocation2] sm:$0xff]  ;;  %v720_v60 = vld [vmem:[#allocation2 + $0x8] sm:$0xf]  ;;  %vm3497_vm3 = vcmp.ne.s16.totalorder %v3025_v17, 0 }
  0xab   : > { %738 = vrot.lane.b32.xlu1 %v2960_v56, %s2761_s14  ;;  %v730_v61 = vsel %vm2924_vm6, %v720_v60, 0  ;;  %v898_v2 = vld [vmem:[#allocation2 + $0x8] sm:$0xff]  ;;  %v774_v12 = vsel %vm772_vm15, %v2960_v56, 0  ;;  %v805_v18 = vsel %vm803_vm5, %v2960_v56, 0  ;;  %v851_v24 = vsel %vm849_vm4, %v2960_v56, 0 }
  0xac   : > { %v920_v58 = vpop.permute.xlu0 %919  ;;  %733 = vst.msk [vmem:[#allocation4 + $0x8] sm:$0xf] %vm732_vm11, %v730_v61  ;;  %v753_v3 = vld [vmem:[#allocation2 + $0x8] sm:$0xf]  ;;  %v880_v29 = vsel %vm878_vm8, %v2960_v56, 0  ;;  %v929_v31 = vsel %vm927_vm0, %v2960_v56, 0 }
  0xad   : > { %828 = vrot.lane.b32.xlu0 %v823_v59, %s2762_s15  ;;  %v2972_v62 = vsel %vm923_vm12, %v2963_v57, %v920_v58  ;;  %v775_v8 = vsel %vm773_vm14, %v753_v3, 0  ;;  %v792_v9 = vld [vmem:[#allocation2 + $0x8] sm:$0xf]  ;;  %v922_v13 = vrot.slane %v920_v58, 4  ;;  %v729_v41 = vsel %vm2919_vm2, %v2960_v56, 0 }
  0xae   : > { %v806_v15 = vsel %vm3509_vm1, %v792_v9, 0  ;;  %v840_v16 = vld [vmem:[#allocation2 + $0x8] sm:$0xf] }
  0xaf   : > { %826 = vrot.lane.b32.xlu1 %v2960_v56, %s2762_s15  ;;  %v925_v20 = vsel %vm3508_vm9, %v2963_v57, %v922_v13  ;;  %v852_v23 = vsel %vm3498_vm10, %v840_v16, 0  ;;  %v869_v26 = vld [vmem:[#allocation2 + $0x8] sm:$0xf]  ;;  %vm3505_vm10 = vcmask 900096  }
  0xb0   : > { %v926_v25 = vsel %vm923_vm12, %v925_v20, %v920_v58  ;;  %v881_v28 = vsel %vm3497_vm3, %v869_v26, 0  ;;  %vm3496_vm12 = vcmask 1039360   ;;  %vm3507_vm3 = vcmask 908288  }
  0xb1   : > { %903 = vrot.lane.b32.xlu0 %v898_v2, %s2763_s16  ;;  %vm928_vm13 = vcmp.ne.s16.totalorder %v926_v25, 0 }
  0xb2   : > { %v930_v30 = vsel %vm928_vm13, %v898_v2, 0  ;;  %vm3499_vm13 = vcmask 1031168  }
  0xb3   : > { %901 = vrot.lane.b32.xlu1 %v2960_v56, %s2763_s16 }
  0xb5   : > { %780 = vrot.lane.b32.xlu0 %v775_v8, %s2764_s17 }
  0xb7   : > { %778 = vrot.lane.b32.xlu1 %v774_v12, %s2764_s17 }
  0xb9   : > { %811 = vrot.lane.b32.xlu0 %v806_v15, %s2765_s18 }
  0xbb   : > { %809 = vrot.lane.b32.xlu1 %v805_v18, %s2765_s18 }
  0xbd   : > { %857 = vrot.lane.b32.xlu0 %v852_v23, %s2766_s19 }
  0xbf   : > { %855 = vrot.lane.b32.xlu1 %v851_v24, %s2766_s19 }
  0xc1   : > { %886 = vrot.lane.b32.xlu0 %v881_v28, %s2767_s20 }
  0xc3   : > { %884 = vrot.lane.b32.xlu1 %v880_v29, %s2767_s20 }
  0xc5   : > { %935 = vrot.lane.b32.xlu0 %v930_v30, %s3512_s27 }
  0xc7   : > { %933 = vrot.lane.b32.xlu1 %v929_v31, %s3512_s27 }
  0xcb   : > { %969 = vperm.xlu1 %2647, %v966_v32  }
 0x11b   : > { %v741_v33 = vpop.permute.xlu0 %740 }
 0x11c   : > { %751 = vst.msk [vmem:[#allocation4 + $0x14] sm:$0xf] %vm732_vm11, %v741_v33  ;;  %v743_v35 = vrot.slane %v741_v33, 4 }
 0x11d   : > { %v739_v34 = vpop.permute.xlu1 %738 }
 0x11e   : > { %v742_v36 = vrot.slane %v739_v34, 4 }
 0x11f   : > { %v829_v37 = vpop.permute.xlu0 %828 }
 0x120   : > { %v745_v38 = vsel %vm3508_vm9, %v742_v36, %v743_v35  ;;  %838 = vst.msk [vmem:[#allocation4 + $0x38] sm:$0xf] %vm732_vm11, %v829_v37  ;;  %v831_v60 = vrot.slane %v829_v37, 4 }
 0x121   : > { %v747_v39 = vsel %vm3496_vm12, %v739_v34, %v745_v38  ;;  %v827_v40 = vpop.permute.xlu1 %826  ;;  %vm3500_vm12 = vcmask 916480  }
 0x122   : > { %v2418_v42 = vcombine.high %v729_v41, %v747_v39  ;;  %v2417_v43 = vcombine.low %v729_v41, %v747_v39  ;;  %v830_v53 = vrot.slane %v827_v40, 4 }
 0x123   : > { %v904_v44 = vpop.permute.xlu0 %903 }
 0x124   : > { %v906_v45 = vrot.slane %v904_v44, 4  ;;  %1058 = vmatprep.subr.bf16.mxu1 %v2418_v42  ;;  %v832_v3 = vsel %vm3508_vm9, %v830_v53, %v831_v60 }
 0x125   : > { %v902_v46 = vpop.permute.xlu1 %901  ;;  %1059 = vmatpush1.bf16.msra.mxu1 %v2417_v43  ;;  %v834_v25 = vsel %vm3507_vm3, %v827_v40, %v832_v3  ;;  %vm1161_vm3 = vcmask 1046532  }
 0x126   : > { %v910_v47 = vsel %vm3503_vm7, %v904_v44, %v906_v45  ;;  %v905_v8 = vrot.slane %v902_v46, 4 }
 0x127   : > { %914 = vst.msk [vmem:[#allocation4 + $0x5c] sm:$0xf] %vm732_vm11, %v910_v47  ;;  %v781_v48 = vpop.permute.xlu0 %780 }
 0x128   : > { %790 = vst.msk [vmem:[#allocation4 + $0x20] sm:$0xf] %vm732_vm11, %v781_v48  ;;  %v783_v52 = vrot.slane %v781_v48, 4  ;;  %v907_v26 = vsel %vm3508_vm9, %v905_v8, %v906_v45 }
 0x129   : > { %v779_v49 = vpop.permute.xlu1 %778  ;;  %v909_v37 = vsel %vm3503_vm7, %v902_v46, %v907_v26  ;;  %vm646_vm7 = vcmask 797448  }
 0x12a   : > { %v782_v50 = vrot.slane %v779_v49, 4  ;;  %647 = vst.msk [vmem:[#allocation3 + $0x8] sm:$0x7] %vm646_vm7, %v2754_v4  ;;  %vm1164_vm7 = vcmask 788480  }
 0x12b   : > { %v812_v51 = vpop.permute.xlu0 %811 }
 0x12c   : > { %821 = vst.msk [vmem:[#allocation4 + $0x2c] sm:$0xf] %vm732_vm11, %v812_v51  ;;  %v784_v56 = vsel %vm3508_vm9, %v782_v50, %v783_v52  ;;  %v814_v58 = vrot.slane %v812_v51, 4  ;;  %v2769_v50 = vmov 0.0   ;;  %v2655_v51 = vld [vmem:[#allocation4 + $0x8] ss:$12 sps:$4 sm:$0xff]  }
 0x12d   : > { %v810_v54 = vpop.permute.xlu1 %809  ;;  %v786_v9 = vsel %vm3499_vm13, %v779_v49, %v784_v56  ;;  %vm3501_vm13 = vcmask 785408   ;;  %v947_v49 = vld [vmem:[%s3486_s3] sm:$0x7] }
 0x12e   : > { %v813_v59 = vrot.slane %v810_v54, 4 }
 0x12f   : > { %v858_v61 = vpop.permute.xlu0 %857 }
 0x130   : > { %v815_v2 = vsel %vm3508_vm9, %v813_v59, %v814_v58  ;;  %867 = vst.msk [vmem:[#allocation4 + $0x44] sm:$0xf] %vm732_vm11, %v858_v61  ;;  %v860_v15 = vrot.slane %v858_v61, 4 }
 0x131   : > { %v817_v12 = vsel %vm3500_vm12, %v810_v54, %v815_v2  ;;  %v856_v13 = vpop.permute.xlu1 %855  ;;  %vm3502_vm12 = vcmask 769024  }
 0x132   : > { %v859_v16 = vrot.slane %v856_v13, 4  ;;  %v2421_v18 = vcombine.high %v786_v9, %v817_v12  ;;  %v2420_v20 = vcombine.low %v786_v9, %v817_v12 }
 0x133   : > { %v887_v23 = vpop.permute.xlu0 %886  ;;  %v2656_v52 = vld [vmem:[#allocation4 + $0x20] ss:$12 sps:$4 sm:$0xff]  }
 0x134   : > { %v861_v24 = vsel %vm3508_vm9, %v859_v16, %v860_v15  ;;  %896 = vst.msk [vmem:[#allocation4 + $0x50] sm:$0xf] %vm732_vm11, %v887_v23  ;;  %1060 = vmatprep.subr.bf16.mxu1 %v2421_v18  ;;  %v889_v30 = vrot.slane %v887_v23, 4 }
 0x135   : > { %v863_v28 = vsel %vm3505_vm10, %v856_v13, %v861_v24  ;;  %v885_v29 = vpop.permute.xlu1 %884  ;;  %1061 = vmatpush1.bf16.msra.mxu1 %v2420_v20  ;;  %vm630_vm10 = vcmask 15367  }
 0x136   : > { %v888_v31 = vrot.slane %v885_v29, 4  ;;  %v2424_v32 = vcombine.high %v834_v25, %v863_v28  ;;  %v2423_v33 = vcombine.low %v834_v25, %v863_v28 }
 0x137   : > { %v936_v34 = vpop.permute.xlu0 %935  ;;  %v2657_v53 = vld [vmem:[#allocation4 + $0x38] ss:$12 sps:$4 sm:$0xff]  }
 0x138   : > { %v890_v35 = vsel %vm3508_vm9, %v888_v31, %v889_v30  ;;  %v938_v36 = vrot.slane %v936_v34, 4  ;;  %1062 = vmatprep.subr.bf16.mxu1 %v2424_v32 }
 0x139   : > { %v892_v38 = vsel %vm3501_vm13, %v885_v29, %v890_v35  ;;  %v934_v39 = vpop.permute.xlu1 %933  ;;  %1063 = vmatpush1.bf16.msra.mxu1 %v2423_v33  ;;  %vm3504_vm13 = vcmask 588800  }
 0x13a   : > { %v942_v40 = vsel %vm3502_vm12, %v936_v34, %v938_v36  ;;  %v937_v41 = vrot.slane %v934_v39, 4  ;;  %v2427_v42 = vcombine.high %v892_v38, %v909_v37  ;;  %v2426_v43 = vcombine.low %v892_v38, %v909_v37 }
 0x13b   : > { %946 = vst.msk [vmem:[#allocation4 + $0x68] sm:$0xf] %vm732_vm11, %v942_v40  ;;  %vm3506_vm11 = vmmov 0   ;;  %v2658_v54 = vld [vmem:[#allocation4 + $0x50] ss:$12 sps:$4 sm:$0xff]  }
 0x13c   : > { %v939_v44 = vsel %vm3508_vm9, %v937_v41, %v938_v36  ;;  %1064 = vmatprep.subr.bf16.mxu1 %v2427_v42 }
 0x13d   : > { %v941_v45 = vsel %vm3502_vm12, %v934_v39, %v939_v44  ;;  %1065 = vmatpush1.bf16.msra.mxu1 %v2426_v43  ;;  %vm644_vm12 = vcmask 2048  }
 0x13e   : > { %v2430_v47 = vcombine.high %v941_v45, %v941_v45  ;;  %v2429_v48 = vcombine.low %v941_v45, %v941_v45  ;;  %645 = vst.msk [vmem:[#allocation3] sm:$0x7] %vm644_vm12, %v2754_v4  ;;  %vm1160_vm12 = vcmask 1042440  }
 0x13f   : > { %vm3121_vm1 = vmor %vm1161_vm3, %vm1160_vm12  ;;  %vm1179_vm3 = vcmask 519168   ;;  %vm3527_vm12 = vcmp.ne.s16.totalorder %v3009_v11, 0 }
 0x140   : > { %2432 = vmatprep.subr.msk.bf16.mxu1 %vm3508_vm9, %v2430_v47  ;;  %v1050_v46 = vsel %vm3508_vm9, %v2429_v48, 0 }
 0x141   : > { %1067 = vmatpush1.bf16.msra.mxu1 %v1050_v46 }
 0x142   : > { %2526 = vmatprep.subr.bf16.mxu1 %v2769_v50  ;;  %v2659_v56 = vld [vmem:[#allocation4 + $0x68] ss:$0 sps:$4 sm:$0xff]  }
 0x143   : > { %v1056_v58 = vsel %vm3508_vm9, %v2659_v56, 0  ;;  %vm1155_vm9 = vcmask 7168  }
 0x144   : > { %2433 = vmatmul.mubr.msk.bf16.vlgmr.msra.gmra.mrb[0].mxu1 %vm3504_vm13, %v947_v49 }
 0x145   : > { %2527 = vmatpush3.bf16.msra.mxu1 %v2655_v51  ;;  %2536 = vmatprep.mubr.msk.bf16.mxu1 %vm3506_vm11, %v2769_v50 }
 0x146   : > { %2528 = vmatprep.subr.bf16.mxu1 %v2769_v50 }
 0x149   : > { %2529 = vmatpush3.bf16.msra.mxu1 %v2656_v52 }
 0x14a   : > { %2530 = vmatprep.subr.bf16.mxu1 %v2769_v50  ;;  %v970_v59 = vpop.permute.xlu1 %969 }
 0x14d   : > { %2531 = vmatpush3.bf16.msra.mxu1 %v2657_v53  ;;  %v1340_v53 = vld [vmem:[%s3489_s6] sm:$0x3f] }
 0x14e   : > { %2532 = vmatprep.subr.bf16.mxu1 %v2769_v50 }
 0x151   : > { %2533 = vmatpush3.bf16.msra.mxu1 %v2658_v54  ;;  %v1511_v54 = vld [vmem:[#allocation5] sm:$0x1] }
 0x152   : > { %2534 = vmatprep.subr.bf16.mxu1 %v2769_v50  ;;  %2569 = vpush %v1511_v54 }
 0x155   : > { %2535 = vmatpush3.bf16.msra.mxu1 %v1056_v58 }
 0x156   : > { %2540 = vmatprep.subr.bf16.mxu1 %v2769_v50 }
 0x158   : > { %2537 = vmatmul.mubr.msk.bf16.vlgmr.msra.gmra.mrb[4].mxu1 %vm3504_vm13, %v947_v49  ;;  %vm629_vm13 = vcmask 1043459  }
 0x159   : > { %2550 = vmatprep.mubr.msk.bf16.mxu1 %vm3506_vm11, %v2769_v50  ;;  %vm631_vm11 = vmor %vm630_vm10, %vm629_vm13  ;;  %vm1170_vm10 = vcmask 395272   ;;  %vm1172_vm13 = vcmask 788872  }
 0x15a   : > { %632 = vst.msk [vmem:[#allocation3 + $0x8] sm:$0x88] %vm631_vm11, %v2754_v4  ;;  %vm3526_vm11 = vcmp.ne.s16.totalorder %v2993_v6, 0 }
 0x217   : > { %v1092_v60 = vpop.f32.mrb[0].mxu1 }
 0x218   : > { %v1093_v61 = vadd.f32 %v1092_v60, %v970_v59  ;;  %v1094_v2 = vpop.f32.mrb[1].mxu1 }
 0x219   : > { %v1095_v3 = vadd.f32 %v1094_v2, %v970_v59  ;;  %v1096_v8 = vpop.f32.mrb[2].mxu1 }
 0x21a   : > { %v1097_v9 = vpop.f32.mrb[3].mxu1 }
 0x21b   : > { %v2502_v12 = vpack.c.bf16 %v1095_v3, %v1093_v61 }
 0x21d   : > { %1150 = vrot.lane.b32.xlu0 %v2502_v12, %s2771_s28 }
 0x22b   : > { %v1133_v13 = vpop.f32.mrb[4].mxu1 }
 0x22c   : > { %v1134_v15 = vadd.f32 %v1133_v13, %v970_v59  ;;  %v2538_v16 = vpop.f32.mrb[5].mxu1 }
 0x22d   : > { %v1136_v18 = vpop.f32.mrb[6].mxu1 }
 0x22e   : > { %v2503_v20 = vpack.c.bf16 %v1134_v15, %v1134_v15  ;;  %v2539_v23 = vpop.f32.mrb[7].mxu1 }
 0x230   : > { %1152 = vrot.lane.b32.xlu1 %v2503_v20, %s2771_s28 }
 0x28f   : > { %v1151_v24 = vpop.permute.xlu0 %1150 }
 0x290   : > { %v1154_v26 = vrot.slane %v1151_v24, 4 }
 0x292   : > { %v1156_v28 = vsel %vm1155_vm9, %v1154_v26, %v1151_v24 }
 0x293   : > { %1163 = vst.msk [vmem:[#allocation3] sm:$0x77] %vm3121_vm1, %v1156_v28 }
 0x294   : > { %1171 = vst.msk [vmem:[#allocation3] sm:$0x7] %vm1170_vm10, %v2754_v4  ;;  %vm3528_vm10 = vcmp.ne.s16.totalorder %v3025_v17, 0 }
 0x29b   : > { %v1181_v29 = vld [vmem:[#allocation3] sm:$0xff] }
 0x29c   : > { %1185 = vrot.lane.b32.xlu0 %v1181_v29, %s2761_s14  ;;  %v1199_v32 = vsel %vm772_vm15, %v1181_v29, 0  ;;  %v1217_v33 = vsel %vm803_vm5, %v1181_v29, 0  ;;  %v1251_v36 = vsel %vm849_vm4, %v1181_v29, 0  ;;  %v1269_v40 = vsel %vm878_vm8, %v1181_v29, 0 }
 0x29d   : > { %v1305_v42 = vsel %vm927_vm0, %v1181_v29, 0  ;;  %v1176_v13 = vsel %vm2919_vm2, %v1181_v29, 0 }
 0x2a0   : > { %1237 = vrot.lane.b32.xlu0 %v1181_v29, %s2762_s15 }
 0x2a2   : > { %v1153_v30 = vpop.permute.xlu1 %1152 }
 0x2a3   : > { %v1157_v31 = vsel %vm1155_vm9, %v1154_v26, %v1153_v30 }
 0x2a4   : > { %1165 = vst.msk [vmem:[#allocation3 + $0x8] sm:$0x7] %vm1164_vm7, %v1157_v31  ;;  %1289 = vrot.lane.b32.xlu0 %v1181_v29, %s2763_s16  ;;  %vm3511_vm7 = vcmp.ne.s16.totalorder %v2972_v62, 0 }
 0x2a5   : > { %1173 = vst.msk [vmem:[#allocation3 + $0x8] sm:$0x7] %vm1172_vm13, %v2754_v4  ;;  %vm3529_vm13 = vcmask 1043456  }
 0x2a8   : > { %1203 = vrot.lane.b32.xlu0 %v1199_v32, %s2764_s17 }
 0x2ac   : > { %1221 = vrot.lane.b32.xlu0 %v1217_v33, %s2765_s18  ;;  %v1182_v34 = vld [vmem:[#allocation3 + $0x8] sm:$0xf] }
 0x2ad   : > { %1187 = vrot.lane.b32.xlu1 %v1182_v34, %s2761_s14  ;;  %v1234_v35 = vld [vmem:[#allocation3 + $0x8] sm:$0xf] }
 0x2ae   : > { %v1175_v37 = vld [vmem:[#allocation3 + $0x8] sm:$0xf] }
 0x2af   : > { %v1177_v38 = vsel %vm2924_vm6, %v1175_v37, 0  ;;  %v1286_v39 = vld [vmem:[#allocation3 + $0x8] sm:$0xf] }
 0x2b0   : > { %1255 = vrot.lane.b32.xlu0 %v1251_v36, %s2766_s19  ;;  %1180 = vst.msk [vmem:[#allocation4 + $0x8] sm:$0xf] %vm1179_vm3, %v1177_v38  ;;  %v1198_v41 = vld [vmem:[#allocation3 + $0x8] sm:$0xf] }
 0x2b1   : > { %1239 = vrot.lane.b32.xlu1 %v1234_v35, %s2762_s15  ;;  %v1200_v43 = vsel %vm773_vm14, %v1198_v41, 0  ;;  %v1216_v44 = vld [vmem:[#allocation3 + $0x8] sm:$0xf] }
 0x2b2   : > { %v1218_v45 = vsel %vm3526_vm11, %v1216_v44, 0  ;;  %v1250_v47 = vld [vmem:[#allocation3 + $0x8] sm:$0xf]  ;;  %vm3530_vm11 = vcmask 1039360  }
 0x2b3   : > { %v1252_v48 = vsel %vm3527_vm12, %v1250_v47, 0  ;;  %v1268_v46 = vld [vmem:[#allocation3 + $0x8] sm:$0xf]  ;;  %vm3531_vm12 = vmmov %vm3529_vm13 }
 0x2b4   : > { %1273 = vrot.lane.b32.xlu0 %v1269_v40, %s2767_s20  ;;  %v1270_v49 = vsel %vm3528_vm10, %v1268_v46, 0  ;;  %v1302_v51 = vld [vmem:[#allocation3 + $0x8] sm:$0xf]  ;;  %vm3532_vm10 = vmmov %vm3531_vm12 }
 0x2b5   : > { %1291 = vrot.lane.b32.xlu1 %v1286_v39, %s2763_s16  ;;  %v1306_v52 = vsel %vm3511_vm7, %v1302_v51, 0  ;;  %vm3535_vm7 = vcmask 916480  }
 0x2b8   : > { %1309 = vrot.lane.b32.xlu0 %v1305_v42, %s3512_s27 }
 0x2b9   : > { %1205 = vrot.lane.b32.xlu1 %v1200_v43, %s2764_s17 }
 0x2bc   : > { %1343 = vperm.xlu0 %2648, %v1340_v53  }
 0x2bd   : > { %1223 = vrot.lane.b32.xlu1 %v1218_v45, %s2765_s18 }
 0x2c1   : > { %1257 = vrot.lane.b32.xlu1 %v1252_v48, %s2766_s19 }
 0x2c5   : > { %1275 = vrot.lane.b32.xlu1 %v1270_v49, %s2767_s20 }
 0x2c9   : > { %1311 = vrot.lane.b32.xlu1 %v1306_v52, %s3512_s27  ;;  %s2570_s27 = spop %2569 }
 0x30e   : > { %v1186_v56 = vpop.permute.xlu0 %1185 }
 0x30f   : > { %v1189_v61 = vrot.slane %v1186_v56, 4 }
 0x312   : > { %v1238_v58 = vpop.permute.xlu0 %1237 }
 0x313   : > { %v1241_v35 = vrot.slane %v1238_v58, 4 }
 0x316   : > { %v3174_v59 = vpop.permute.xlu0 %1289 }
 0x317   : > { %v1293_v48 = vrot.slane %v3174_v59, 4 }
 0x31a   : > { %v1204_v3 = vpop.permute.xlu0 %1203 }
 0x31b   : > { %v1207_v29 = vrot.slane %v1204_v3, 4 }
 0x31e   : > { %v1222_v18 = vpop.permute.xlu0 %1221 }
 0x31f   : > { %v1188_v60 = vpop.permute.xlu1 %1187  ;;  %v1225_v32 = vrot.slane %v1222_v18, 4 }
 0x320   : > { %v1190_v2 = vrot.slane %v1188_v60, 4  ;;  %1196 = vst.msk [vmem:[#allocation4 + $0x14] sm:$0xf] %vm1179_vm3, %v1188_v60 }
 0x322   : > { %v1191_v8 = vsel %vm3529_vm13, %v1189_v61, %v1190_v2  ;;  %v1256_v28 = vpop.permute.xlu0 %1255  ;;  %vm3533_vm13 = vmmov %vm3532_vm10 }
 0x323   : > { %v1192_v9 = vsel %vm3530_vm11, %v1186_v56, %v1191_v8  ;;  %v1240_v12 = vpop.permute.xlu1 %1239  ;;  %v1259_v37 = vrot.slane %v1256_v28, 4  ;;  %vm3534_vm11 = vcmask 1031168  }
 0x324   : > { %1248 = vst.msk [vmem:[#allocation4 + $0x38] sm:$0xf] %vm1179_vm3, %v1240_v12  ;;  %v2438_v15 = vcombine.high %v1176_v13, %v1192_v9  ;;  %v2437_v16 = vcombine.low %v1176_v13, %v1192_v9  ;;  %v1242_v30 = vrot.slane %v1240_v12, 4 }
 0x326   : > { %1430 = vmatprep.subr.bf16.mxu0 %v2438_v15  ;;  %v1243_v38 = vsel %vm3533_vm13, %v1241_v35, %v1242_v30  ;;  %v1274_v39 = vpop.permute.xlu0 %1273  ;;  %vm3538_vm13 = vcmask 900096   ;;  %v1516_v35 = vstv %s2570_s27  ;;  %s3553_s27 = smov 94  }
 0x327   : > { %v1292_v20 = vpop.permute.xlu1 %1291  ;;  %v2660_v23 = vld [vmem:[#allocation4 + $0x8] ss:$12 sps:$4 sm:$0xff]   ;;  %1431 = vmatpush1.bf16.msra.mxu0 %v2437_v16  ;;  %v1277_v51 = vrot.slane %v1274_v39, 4 }
 0x328   : > { %1300 = vst.msk [vmem:[#allocation4 + $0x5c] sm:$0xf] %vm1179_vm3, %v1292_v20  ;;  %2541 = vmatpush3.bf16.msra.mxu1 %v2660_v23  ;;  %v1294_v43 = vrot.slane %v1292_v20, 4 }
 0x329   : > { %2542 = vmatprep.subr.bf16.mxu1 %v2769_v50 }
 0x32b   : > { %v1206_v24 = vpop.permute.xlu1 %1205 }
 0x32c   : > { %v1208_v26 = vrot.slane %v1206_v24, 4  ;;  %1214 = vst.msk [vmem:[#allocation4 + $0x20] sm:$0xf] %vm1179_vm3, %v1206_v24 }
 0x32e   : > { %v1209_v33 = vsel %vm3531_vm12, %v1207_v29, %v1208_v26  ;;  %vm3536_vm12 = vmmov %vm3532_vm10 }
 0x32f   : > { %v1224_v31 = vpop.permute.xlu1 %1223  ;;  %v1210_v40 = vsel %vm3534_vm11, %v1204_v3, %v1209_v33  ;;  %v1310_v3 = vpop.permute.xlu0 %1309 }
 0x330   : > { %v1226_v34 = vrot.slane %v1224_v31, 4  ;;  %1232 = vst.msk [vmem:[#allocation4 + $0x2c] sm:$0xf] %vm1179_vm3, %v1224_v31  ;;  %v1313_v15 = vrot.slane %v1310_v3, 4  ;;  %v1321_v31 = vld [vmem:[%s3488_s5] sm:$0x7] }
 0x332   : > { %v1227_v36 = vsel %vm3532_vm10, %v1225_v32, %v1226_v34  ;;  %vm3537_vm10 = vcmask 908288  }
 0x333   : > { %v1228_v41 = vsel %vm3535_vm7, %v1222_v18, %v1227_v36  ;;  %v1258_v42 = vpop.permute.xlu1 %1257  ;;  %v1244_v49 = vsel %vm3537_vm10, %v1238_v58, %v1243_v38  ;;  %vm3539_vm7 = vmmov %vm3536_vm12  ;;  %vm3542_vm10 = vcmask 785408  }
 0x334   : > { %v1260_v44 = vrot.slane %v1258_v42, 4  ;;  %1266 = vst.msk [vmem:[#allocation4 + $0x44] sm:$0xf] %vm1179_vm3, %v1258_v42  ;;  %v2441_v45 = vcombine.high %v1210_v40, %v1228_v41  ;;  %v2440_v47 = vcombine.low %v1210_v40, %v1228_v41  ;;  %v1295_v56 = vsel %vm3539_vm7, %v1293_v48, %v1294_v43  ;;  %vm3540_vm11 = vmmov %vm3539_vm7 }
 0x336   : > { %v1261_v46 = vsel %vm3536_vm12, %v1259_v37, %v1260_v44  ;;  %1432 = vmatprep.subr.bf16.mxu0 %v2441_v45  ;;  %vm3541_vm12 = vcmask 777216  }
 0x337   : > { %v1262_v52 = vsel %vm3538_vm13, %v1256_v28, %v1261_v46  ;;  %v1276_v53 = vpop.permute.xlu1 %1275  ;;  %v2661_v54 = vld [vmem:[#allocation4 + $0x20] ss:$12 sps:$4 sm:$0xff]   ;;  %1433 = vmatpush1.bf16.msra.mxu0 %v2440_v47  ;;  %v1296_v58 = vsel %vm3541_vm12, %v3174_v59, %v1295_v56  ;;  %vm3543_vm13 = vmmov %vm3539_vm7  ;;  %vm3544_vm7 = vcmask 769024  }
 0x338   : > { %v1278_v60 = vrot.slane %v1276_v53, 4  ;;  %1284 = vst.msk [vmem:[#allocation4 + $0x50] sm:$0xf] %vm1179_vm3, %v1276_v53  ;;  %v2444_v61 = vcombine.high %v1244_v49, %v1262_v52  ;;  %v2443_v2 = vcombine.low %v1244_v49, %v1262_v52  ;;  %2543 = vmatpush3.bf16.msra.mxu1 %v2661_v54 }
 0x339   : > { %2544 = vmatprep.subr.bf16.mxu1 %v2769_v50 }
 0x33a   : > { %v1279_v8 = vsel %vm3540_vm11, %v1277_v51, %v1278_v60  ;;  %1434 = vmatprep.subr.bf16.mxu0 %v2444_v61 }
 0x33b   : > { %v1280_v9 = vsel %vm3542_vm10, %v1274_v39, %v1279_v8  ;;  %v1312_v12 = vpop.permute.xlu1 %1311  ;;  %v2662_v13 = vld [vmem:[#allocation4 + $0x38] ss:$12 sps:$4 sm:$0xff]   ;;  %1435 = vmatpush1.bf16.msra.mxu0 %v2443_v2  ;;  %vm3547_vm10 = vcmask 588800   ;;  %v1344_v33 = vpop.permute.xlu0 %1343 }
 0x33c   : > { %v1314_v16 = vrot.slane %v1312_v12, 4  ;;  %1320 = vst.msk [vmem:[#allocation4 + $0x68] sm:$0xf] %vm1179_vm3, %v1312_v12  ;;  %v2447_v18 = vcombine.high %v1280_v9, %v1296_v58  ;;  %v2446_v20 = vcombine.low %v1280_v9, %v1296_v58  ;;  %2545 = vmatpush3.bf16.msra.mxu1 %v2662_v13  ;;  %vm3545_vm3 = vmmov %vm3540_vm11 }
 0x33d   : > { %2546 = vmatprep.subr.bf16.mxu1 %v2769_v50  ;;  %vm3546_vm12 = vmmov %vm3545_vm3 }
 0x33e   : > { %v1315_v23 = vsel %vm3543_vm13, %v1313_v15, %v1314_v16  ;;  %1436 = vmatprep.subr.bf16.mxu0 %v2447_v18  ;;  %vm3548_vm13 = vmmov %vm3547_vm10 }
 0x33f   : > { %v1316_v24 = vsel %vm3544_vm7, %v1310_v3, %v1315_v23  ;;  %v2663_v59 = vld [vmem:[#allocation4 + $0x50] ss:$12 sps:$4 sm:$0xff]   ;;  %1437 = vmatpush1.bf16.msra.mxu0 %v2446_v20  ;;  %vm3549_vm7 = vmmov 0  }
 0x340   : > { %v2450_v26 = vcombine.high %v1316_v24, %v1316_v24  ;;  %v2449_v28 = vcombine.low %v1316_v24, %v1316_v24  ;;  %2547 = vmatpush3.bf16.msra.mxu1 %v2663_v59 }
 0x341   : > { %2548 = vmatprep.subr.bf16.mxu1 %v2769_v50 }
 0x342   : > { %2452 = vmatprep.subr.msk.bf16.mxu0 %vm3540_vm11, %v2450_v26  ;;  %v1422_v29 = vsel %vm3545_vm3, %v2449_v28, 0 }
 0x343   : > { %v2664_v30 = vld [vmem:[#allocation4 + $0x68] ss:$0 sps:$4 sm:$0xff]   ;;  %1439 = vmatpush1.bf16.msra.mxu0 %v1422_v29 }
 0x344   : > { %v1428_v32 = vsel %vm3546_vm12, %v2664_v30, 0  ;;  %v1888_v30 = vld [vmem:[#allocation3] sm:$0x77] }
 0x345   : > { %2549 = vmatpush3.bf16.msra.mxu1 %v1428_v32 }
 0x346   : > { %2453 = vmatmul.mubr.msk.bf16.vlgmr.msra.gmra.mrb[0].mxu0 %vm3547_vm10, %v1321_v31  ;;  %2554 = vmatprep.subr.bf16.mxu1 %v2769_v50  ;;  %vm1549_vm10 = vcmask 264200  }
 0x347   : > { %1839 = vmatprep.mubr.bf16.mxu0 %v2754_v4 }
 0x348   : > { %2551 = vmatmul.mubr.msk.bf16.vlgmr.msra.gmra.mrb[8].mxu1 %vm3548_vm13, %v1321_v31  ;;  %vm1544_vm13 = vcmask 526336  }
 0x349   : > { %2564 = vmatprep.mubr.msk.bf16.mxu1 %vm3549_vm7, %v2769_v50  ;;  %vm1551_vm7 = vcmask 526600  }
 0x419   : > { %v1464_v34 = vpop.f32.mrb[0].mxu0 }
 0x41a   : > { %v1465_v36 = vadd.f32 %v1464_v34, %v1344_v33  ;;  %v1466_v37 = vpop.f32.mrb[1].mxu0 }
 0x41b   : > { %v1467_v38 = vadd.f32 %v1466_v37, %v1344_v33  ;;  %v1468_v39 = vpop.f32.mrb[2].mxu0  ;;  %v1505_v40 = vpop.f32.mrb[8].mxu1 }
 0x41c   : > { %vm1513_vm11 = vcmp.ge.f32.partialorder %v1465_v36, 0.0  ;;  %v1517_v41 = vmul.f32 %v1516_v35, %v1465_v36  ;;  %v1469_v42 = vpop.f32.mrb[3].mxu0  ;;  %v1506_v43 = vadd.f32 %v1505_v40, %v1344_v33  ;;  %v2552_v45 = vpop.f32.mrb[9].mxu1  ;;  %v1891_v33 = vunpack.c.h.bf16 %v1888_v30 }
 0x41d   : > { %vm1514_vm3 = vcmp.ge.f32.partialorder %v1467_v38, 0.0  ;;  %v1518_v44 = vmul.f32 %v1516_v35, %v1467_v38  ;;  %v1508_v47 = vpop.f32.mrb[10].mxu1 }
 0x41e   : > { %v1520_v48 = vsel %vm1513_vm11, %v1465_v36, %v1517_v41  ;;  %v1519_v46 = vmul.f32 %v1516_v35, %v1506_v43  ;;  %v2553_v49 = vpop.f32.mrb[11].mxu1  ;;  %vm1515_vm12 = vcmp.ge.f32.partialorder %v1506_v43, 0.0  ;;  %vm1558_vm11 = vcmask 257024   ;;  %v1717_v35 = vld [vmem:[%s3492_s9] sm:$0x3f] }
 0x41f   : > { %v1521_v51 = vsel %vm1514_vm3, %v1467_v38, %v1518_v44  ;;  %vm3552_vm3 = vcmp.ne.s16.totalorder %v3025_v17, 0  ;;  %v1889_v17 = vld [vmem:[#allocation3 + $0x8] sm:$0x7] }
 0x420   : > { %v2504_v52 = vpack.c.bf16 %v1521_v51, %v1520_v48  ;;  %v1522_v53 = vsel %vm1515_vm12, %v1506_v43, %v1519_v46  ;;  %vm3554_vm12 = vcmp.ne.s16.totalorder %v2972_v62, 0  ;;  %v1892_v37 = vunpack.c.l.bf16 %v1889_v17 }
 0x421   : > { %v2505_v54 = vpack.c.bf16 %v1522_v53, %v1522_v53 }
 0x422   : > { %1534 = vrot.lane.b32.xlu1 %v2504_v52, %s2771_s28 }
 0x426   : > { %1536 = vrot.lane.b32.xlu1 %v2505_v54, %s2771_s28 }
 0x494   : > { %v1535_v56 = vpop.permute.xlu1 %1534 }
 0x495   : > { %v1538_v60 = vrot.slane %v1535_v56, 4 }
 0x497   : > { %v1539_v61 = vsel %vm1155_vm9, %v1538_v60, %v1535_v56 }
 0x498   : > { %1543 = vst.msk [vmem:[#allocation2] sm:$0x77] %vm3121_vm1, %v1539_v61  ;;  %v1537_v2 = vpop.permute.xlu1 %1536 }
 0x499   : > { %v1540_v3 = vsel %vm1155_vm9, %v1538_v60, %v1537_v2  ;;  %1550 = vst.msk [vmem:[#allocation2] sm:$0x7] %vm1549_vm10, %v2754_v4  ;;  %vm3555_vm10 = vcmask 1043456  }
 0x49a   : > { %1545 = vst.msk [vmem:[#allocation2 + $0x8] sm:$0x7] %vm1544_vm13, %v1540_v3  ;;  %vm3556_vm13 = vcmask 1039360  }
 0x49b   : > { %1552 = vst.msk [vmem:[#allocation2 + $0x8] sm:$0x7] %vm1551_vm7, %v2754_v4  ;;  %vm3557_vm7 = vmmov %vm3555_vm10 }
 0x4a0   : > { %v1560_v8 = vld [vmem:[#allocation2] sm:$0xff] }
 0x4a1   : > { %1564 = vrot.lane.b32.xlu0 %v1560_v8, %s2761_s14  ;;  %v1578_v18 = vsel %vm772_vm15, %v1560_v8, 0  ;;  %v1596_v23 = vsel %vm803_vm5, %v1560_v8, 0  ;;  %v1630_v26 = vsel %vm849_vm4, %v1560_v8, 0  ;;  %v1648_v29 = vsel %vm878_vm8, %v1560_v8, 0 }
 0x4a2   : > { %v1561_v58 = vld [vmem:[#allocation2 + $0x8] sm:$0xf]  ;;  %v1682_v32 = vsel %vm927_vm0, %v1560_v8, 0  ;;  %v1555_v45 = vsel %vm2919_vm2, %v1560_v8, 0 }
 0x4a3   : > { %1566 = vrot.lane.b32.xlu1 %v1561_v58, %s2761_s14  ;;  %v1613_v9 = vld [vmem:[#allocation2 + $0x8] sm:$0xf] }
 0x4a4   : > { %v1554_v12 = vld [vmem:[#allocation2 + $0x8] sm:$0xf] }
 0x4a5   : > { %1616 = vrot.lane.b32.xlu0 %v1560_v8, %s2762_s15  ;;  %v1556_v13 = vsel %vm2924_vm6, %v1554_v12, 0  ;;  %v1665_v15 = vld [vmem:[#allocation2 + $0x8] sm:$0xf]  ;;  %vm3550_vm6 = vcmp.ne.s16.totalorder %v2993_v6, 0 }
 0x4a6   : > { %1559 = vst.msk [vmem:[#allocation4 + $0x8] sm:$0xf] %vm1558_vm11, %v1556_v13  ;;  %v1577_v16 = vld [vmem:[#allocation2 + $0x8] sm:$0xf] }
 0x4a7   : > { %1618 = vrot.lane.b32.xlu1 %v1613_v9, %s2762_s15  ;;  %v1579_v20 = vsel %vm773_vm14, %v1577_v16, 0  ;;  %v1595_v22 = vld [vmem:[#allocation2 + $0x8] sm:$0xf]  ;;  %vm3551_vm14 = vcmp.ne.s16.totalorder %v3009_v11, 0  ;;  %v1890_v11 = vunpack.c.l.bf16 %v1888_v30 }
 0x4a8   : > { %v1597_v24 = vsel %vm3550_vm6, %v1595_v22, 0  ;;  %v1629_v59 = vld [vmem:[#allocation2 + $0x8] sm:$0xf]  ;;  %vm3558_vm6 = vmmov %vm3557_vm7 }
 0x4a9   : > { %1668 = vrot.lane.b32.xlu0 %v1560_v8, %s2763_s16  ;;  %v1631_v63 = vsel %vm3551_vm14, %v1629_v59, 0  ;;  %v1647_v28 = vld [vmem:[#allocation2 + $0x8] sm:$0xf]  ;;  %v2649_v36 = vpack.i.bf16 %v1891_v33, %v1890_v11  ;;  %vm3559_vm14 = vmmov %vm3558_vm6 }
 0x4aa   : > { %v1649_v6 = vsel %vm3552_vm3, %v1647_v28, 0  ;;  %v1681_v31 = vld [vmem:[#allocation2 + $0x8] sm:$0xf]  ;;  %vm3560_vm3 = vcmask 1031168  }
 0x4ab   : > { %1670 = vrot.lane.b32.xlu1 %v1665_v15, %s2763_s16  ;;  %v1683_v34 = vsel %vm3554_vm12, %v1681_v31, 0  ;;  %vm3561_vm12 = vcmask 916480  }
 0x4ad   : > { %1582 = vrot.lane.b32.xlu0 %v1578_v18, %s2764_s17 }
 0x4af   : > { %1584 = vrot.lane.b32.xlu1 %v1579_v20, %s2764_s17 }
 0x4b1   : > { %1600 = vrot.lane.b32.xlu0 %v1596_v23, %s2765_s18 }
 0x4b3   : > { %1602 = vrot.lane.b32.xlu1 %v1597_v24, %s2765_s18 }
 0x4b5   : > { %1634 = vrot.lane.b32.xlu0 %v1630_v26, %s2766_s19 }
 0x4b7   : > { %1636 = vrot.lane.b32.xlu1 %v1631_v63, %s2766_s19 }
 0x4b9   : > { %1652 = vrot.lane.b32.xlu0 %v1648_v29, %s2767_s20 }
 0x4bb   : > { %1654 = vrot.lane.b32.xlu1 %v1649_v6, %s2767_s20 }
 0x4bd   : > { %1686 = vrot.lane.b32.xlu0 %v1682_v32, %s3553_s27 }
 0x4bf   : > { %1688 = vrot.lane.b32.xlu1 %v1683_v34, %s3553_s27 }
 0x4c1   : > { %1720 = vperm.xlu0 %2648, %v1717_v35  }
 0x4c3   : > { %2650 = vrot.lane.b32.xlu1 %v2649_v36, %s2763_s16 }
 0x4c5   : > { %1900 = vrot.lane.b32.xlu0 %v1892_v37, %s2763_s16 }
 0x513   : > { %v1565_v38 = vpop.permute.xlu0 %1564 }
 0x514   : > { %v1568_v40 = vrot.slane %v1565_v38, 4 }
 0x515   : > { %v1567_v39 = vpop.permute.xlu1 %1566 }
 0x516   : > { %v1569_v41 = vrot.slane %v1567_v39, 4  ;;  %1575 = vst.msk [vmem:[#allocation4 + $0x14] sm:$0xf] %vm1558_vm11, %v1567_v39 }
 0x517   : > { %v1617_v62 = vpop.permute.xlu0 %1616 }
 0x518   : > { %v1570_v42 = vsel %vm3555_vm10, %v1568_v40, %v1569_v41  ;;  %v1620_v9 = vrot.slane %v1617_v62, 4  ;;  %vm3562_vm10 = vmmov %vm3558_vm6 }
 0x519   : > { %v1571_v43 = vsel %vm3556_vm13, %v1565_v38, %v1570_v42  ;;  %v1619_v44 = vpop.permute.xlu1 %1618  ;;  %vm3563_vm13 = vcmask 908288  }
 0x51a   : > { %1627 = vst.msk [vmem:[#allocation4 + $0x38] sm:$0xf] %vm1558_vm11, %v1619_v44  ;;  %v2458_v47 = vcombine.high %v1555_v45, %v1571_v43  ;;  %v2457_v48 = vcombine.low %v1555_v45, %v1571_v43  ;;  %v1621_v61 = vrot.slane %v1619_v44, 4 }
 0x51b   : > { %v1669_v46 = vpop.permute.xlu0 %1668 }
 0x51c   : > { %1807 = vmatprep.subr.bf16.mxu0 %v2458_v47  ;;  %v1622_v15 = vsel %vm3559_vm14, %v1620_v9, %v1621_v61  ;;  %v1672_v63 = vrot.slane %v1669_v46, 4 }
 0x51d   : > { %v1671_v49 = vpop.permute.xlu1 %1670  ;;  %v2665_v51 = vld [vmem:[#allocation4 + $0x8] ss:$12 sps:$4 sm:$0xff]   ;;  %1808 = vmatpush1.bf16.msra.mxu0 %v2457_v48  ;;  %v1623_v6 = vsel %vm3563_vm13, %v1617_v62, %v1622_v15  ;;  %vm3570_vm13 = vcmask 769024  }
 0x51e   : > { %1679 = vst.msk [vmem:[#allocation4 + $0x5c] sm:$0xf] %vm1558_vm11, %v1671_v49  ;;  %2555 = vmatpush3.bf16.msra.mxu1 %v2665_v51  ;;  %v1673_v16 = vrot.slane %v1671_v49, 4 }
 0x51f   : > { %v1583_v52 = vpop.permute.xlu0 %1582  ;;  %2556 = vmatprep.subr.bf16.mxu1 %v2769_v50 }
 0x520   : > { %v1586_v60 = vrot.slane %v1583_v52, 4 }
 0x521   : > { %v1585_v53 = vpop.permute.xlu1 %1584 }
 0x522   : > { %v1587_v54 = vrot.slane %v1585_v53, 4  ;;  %1593 = vst.msk [vmem:[#allocation4 + $0x20] sm:$0xf] %vm1558_vm11, %v1585_v53  ;;  %v1698_v53 = vld [vmem:[%s3491_s8] sm:$0x7] }
 0x523   : > { %v1601_v56 = vpop.permute.xlu0 %1600 }
 0x524   : > { %v1588_v3 = vsel %vm3557_vm7, %v1586_v60, %v1587_v54  ;;  %v1604_v8 = vrot.slane %v1601_v56, 4  ;;  %vm3564_vm7 = vmmov %vm3558_vm6 }
 0x525   : > { %v1603_v2 = vpop.permute.xlu1 %1602  ;;  %v1589_v18 = vsel %vm3560_vm3, %v1583_v52, %v1588_v3  ;;  %v1674_v30 = vsel %vm3564_vm7, %v1672_v63, %v1673_v16  ;;  %vm3566_vm14 = vmmov %vm3564_vm7  ;;  %vm3567_vm3 = vcmask 777216  }
 0x526   : > { %v1605_v58 = vrot.slane %v1603_v2, 4  ;;  %1611 = vst.msk [vmem:[#allocation4 + $0x2c] sm:$0xf] %vm1558_vm11, %v1603_v2  ;;  %v1675_v38 = vsel %vm3567_vm3, %v1669_v46, %v1674_v30 }
 0x527   : > { %v1635_v12 = vpop.permute.xlu0 %1634 }
 0x528   : > { %v1606_v13 = vsel %vm3558_vm6, %v1604_v8, %v1605_v58  ;;  %v1638_v23 = vrot.slane %v1635_v12, 4  ;;  %vm3565_vm6 = vcmask 900096  }
 0x529   : > { %v1607_v20 = vsel %vm3561_vm12, %v1601_v56, %v1606_v13  ;;  %v1637_v22 = vpop.permute.xlu1 %1636  ;;  %vm3568_vm12 = vcmask 785408  }
 0x52a   : > { %v1639_v24 = vrot.slane %v1637_v22, 4  ;;  %1645 = vst.msk [vmem:[#allocation4 + $0x44] sm:$0xf] %vm1558_vm11, %v1637_v22  ;;  %v2461_v59 = vcombine.high %v1589_v18, %v1607_v20  ;;  %v2460_v26 = vcombine.low %v1589_v18, %v1607_v20 }
 0x52b   : > { %v1653_v28 = vpop.permute.xlu0 %1652 }
 0x52c   : > { %v1640_v29 = vsel %vm3562_vm10, %v1638_v23, %v1639_v24  ;;  %1809 = vmatprep.subr.bf16.mxu0 %v2461_v59  ;;  %v1656_v33 = vrot.slane %v1653_v28, 4  ;;  %vm3569_vm10 = vmmov %vm3564_vm7 }
 0x52d   : > { %v1641_v31 = vsel %vm3565_vm6, %v1635_v12, %v1640_v29  ;;  %v1655_v32 = vpop.permute.xlu1 %1654  ;;  %v2666_v11 = vld [vmem:[#allocation4 + $0x20] ss:$12 sps:$4 sm:$0xff]   ;;  %1810 = vmatpush1.bf16.msra.mxu0 %v2460_v26  ;;  %vm3572_vm6 = vmmov %vm3564_vm7 }
 0x52e   : > { %v1657_v34 = vrot.slane %v1655_v32, 4  ;;  %1663 = vst.msk [vmem:[#allocation4 + $0x50] sm:$0xf] %vm1558_vm11, %v1655_v32  ;;  %v2464_v35 = vcombine.high %v1623_v6, %v1641_v31  ;;  %v2463_v17 = vcombine.low %v1623_v6, %v1641_v31  ;;  %2557 = vmatpush3.bf16.msra.mxu1 %v2666_v11 }
 0x52f   : > { %v1687_v36 = vpop.permute.xlu0 %1686  ;;  %2558 = vmatprep.subr.bf16.mxu1 %v2769_v50 }
 0x530   : > { %v1658_v37 = vsel %vm3566_vm14, %v1656_v33, %v1657_v34  ;;  %1811 = vmatprep.subr.bf16.mxu0 %v2464_v35  ;;  %v1690_v62 = vrot.slane %v1687_v36, 4  ;;  %vm3573_vm14 = vcmask 588800  }
 0x531   : > { %v1659_v39 = vsel %vm3568_vm12, %v1653_v28, %v1658_v37  ;;  %v1689_v40 = vpop.permute.xlu1 %1688  ;;  %v2667_v41 = vld [vmem:[#allocation4 + $0x38] ss:$12 sps:$4 sm:$0xff]   ;;  %1812 = vmatpush1.bf16.msra.mxu0 %v2463_v17  ;;  %vm3574_vm3 = vmmov %vm3573_vm14  ;;  %vm3575_vm12 = vcmask 777216  }
 0x532   : > { %v1691_v42 = vrot.slane %v1689_v40, 4  ;;  %1697 = vst.msk [vmem:[#allocation4 + $0x68] sm:$0xf] %vm1558_vm11, %v1689_v40  ;;  %v2467_v43 = vcombine.high %v1659_v39, %v1675_v38  ;;  %v2466_v44 = vcombine.low %v1659_v39, %v1675_v38  ;;  %2559 = vmatpush3.bf16.msra.mxu1 %v2667_v41  ;;  %vm3571_vm11 = vmmov %vm3564_vm7 }
 0x533   : > { %2560 = vmatprep.subr.bf16.mxu1 %v2769_v50 }
 0x534   : > { %v1692_v45 = vsel %vm3569_vm10, %v1690_v62, %v1691_v42  ;;  %1813 = vmatprep.subr.bf16.mxu0 %v2467_v43  ;;  %vm3576_vm10 = vmmov %vm3575_vm12  ;;  %v2090_v43 = vld [vmem:[%s3494_s11 + $0x20] sm:$0xff] }
 0x535   : > { %v1693_v47 = vsel %vm3570_vm13, %v1687_v36, %v1692_v45  ;;  %v2668_v48 = vld [vmem:[#allocation4 + $0x50] ss:$12 sps:$4 sm:$0xff]   ;;  %1814 = vmatpush1.bf16.msra.mxu0 %v2466_v44  ;;  %v2651_v56 = vpop.permute.xlu1 %2650  ;;  %vm1932_vm13 = vcmask 264192   ;;  %v2091_v44 = vld [vmem:[%s3494_s11 + $0x28] sm:$0xff] }
 0x536   : > { %v2470_v46 = vcombine.high %v1693_v47, %v1693_v47  ;;  %v2469_v49 = vcombine.low %v1693_v47, %v1693_v47  ;;  %2561 = vmatpush3.bf16.msra.mxu1 %v2668_v48  ;;  %v2653_v60 = vunpack.i.h.bf16 %v2651_v56  ;;  %v2652_v61 = vunpack.i.l.bf16 %v2651_v56 }
 0x537   : > { %2562 = vmatprep.subr.bf16.mxu1 %v2769_v50 }
 0x538   : > { %2472 = vmatprep.subr.msk.bf16.mxu0 %vm3564_vm7, %v2470_v46  ;;  %v1799_v51 = vsel %vm3571_vm11, %v2469_v49, 0  ;;  %v1903_v9 = vsel %vm3575_vm12, %v2652_v61, %v2653_v60  ;;  %vm1937_vm7 = vcmask 133128   ;;  %vm1939_vm11 = vcmask 264328  }
 0x539   : > { %v2669_v52 = vld [vmem:[#allocation4 + $0x68] ss:$0 sps:$4 sm:$0xff]   ;;  %1816 = vmatpush1.bf16.msra.mxu0 %v1799_v51 }
 0x53a   : > { %v1805_v54 = vsel %vm3572_vm6, %v2669_v52, 0 }
 0x53b   : > { %2563 = vmatpush3.bf16.msra.mxu1 %v1805_v54 }
 0x53c   : > { %2473 = vmatmul.mubr.msk.bf16.vlgmr.msra.gmra.mrb[4].mxu0 %vm3573_vm14, %v1698_v53 }
 0x53d   : > { %2229 = vmatprep.mubr.bf16.mxu0 %v2754_v4 }
 0x53e   : > { %2565 = vmatmul.mubr.msk.bf16.vlgmr.msra.gmra.mrb[12].mxu1 %vm3574_vm3, %v1698_v53  ;;  %vm3582_vm3 = vmmov %vm3576_vm10 }
 0x540   : > { %v1721_v50 = vpop.permute.xlu0 %1720 }
 0x544   : > { %v1901_v2 = vpop.permute.xlu0 %1900 }
 0x545   : > { %v1904_v15 = vsel %vm3576_vm10, %v2653_v60, %v1901_v2  ;;  %vm3584_vm10 = vcmask 1031168  }
 0x60f   : > { %v1841_v3 = vpop.f32.mrb[4].mxu0 }
 0x610   : > { %v1842_v8 = vadd.f32 %v1841_v3, %v1721_v50  ;;  %v1843_v58 = vpop.f32.mrb[5].mxu0 }
 0x611   : > { %v1844_v12 = vadd.f32 %v1843_v58, %v1721_v50  ;;  %v1845_v13 = vpop.f32.mrb[6].mxu0  ;;  %v1882_v16 = vpop.f32.mrb[12].mxu1 }
 0x612   : > { %v1908_v18 = vadd.f32 %v1903_v9, %v1842_v8  ;;  %v1846_v20 = vpop.f32.mrb[7].mxu0  ;;  %v1883_v22 = vadd.f32 %v1882_v16, %v1721_v50  ;;  %v2566_v24 = vpop.f32.mrb[13].mxu1 }
 0x613   : > { %v1909_v23 = vadd.f32 %v1904_v15, %v1844_v12  ;;  %v1885_v59 = vpop.f32.mrb[14].mxu1 }
 0x614   : > { %v1910_v26 = vadd.f32 %v1901_v2, %v1883_v22  ;;  %v2567_v63 = vpop.f32.mrb[15].mxu1 }
 0x615   : > { %v2506_v28 = vpack.c.bf16 %v1909_v23, %v1908_v18 }
 0x616   : > { %v2507_v29 = vpack.c.bf16 %v1910_v26, %v1910_v26 }
 0x617   : > { %1922 = vrot.lane.b32.xlu1 %v2506_v28, %s2771_s28 }
 0x618   : > { %1924 = vrot.lane.b32.xlu0 %v2507_v29, %s2771_s28  ;;  %s517_s28 = sand.u32 1, %s2735_s22  }
 0x689   : > { %v1923_v6 = vpop.permute.xlu1 %1922 }
 0x68a   : > { %v1926_v30 = vrot.slane %v1923_v6, 4  ;;  %v1925_v31 = vpop.permute.xlu0 %1924 }
 0x68c   : > { %v1927_v32 = vsel %vm1155_vm9, %v1926_v30, %v1923_v6  ;;  %v1928_v11 = vsel %vm1155_vm9, %v1926_v30, %v1925_v31  ;;  %vm2008_vm9 = vcmp.ne.s16.totalorder %v2990_v5, 0 }
 0x68d   : > { %1933 = vst.msk [vmem:[#allocation2 + $0x8] sm:$0x7] %vm1932_vm13, %v1928_v11 }
 0x68e   : > { %1931 = vst.msk [vmem:[#allocation2] sm:$0x77] %vm3121_vm1, %v1927_v32  ;;  %vm1960_vm1 = vcmp.ne.s16.totalorder %v2958_v55, 0 }
 0x68f   : > { %1938 = vst.msk [vmem:[#allocation2] sm:$0x7] %vm1937_vm7, %v2754_v4  ;;  %vm3586_vm7 = vcmask 916480  }
 0x690   : > { %1940 = vst.msk [vmem:[#allocation2 + $0x8] sm:$0x7] %vm1939_vm11, %v2754_v4 }
 0x696   : > { %v1944_v33 = vld [vmem:[#allocation2] sm:$0xff] }
 0x697   : > { %v1945_v34 = vld [vmem:[#allocation2 + $0x8] sm:$0xf]  ;;  %1948 = vrot.lane.b32.xlu1 %v1944_v33, %s2761_s14  ;;  %v3325_v17 = vsel %vm2919_vm2, %v1944_v33, 0  ;;  %v1961_v37 = vsel %vm772_vm15, %v1944_v33, 0  ;;  %vm1977_vm2 = vcmp.ne.s16.totalorder %v2978_v0, 0  ;;  %v1978_v39 = vsel %vm803_vm5, %v1944_v33, 0 }
 0x698   : > { %1950 = vrot.lane.b32.xlu0 %v1945_v34, %s2761_s14  ;;  %v1993_v35 = vld [vmem:[#allocation2 + $0x8] sm:$0xf]  ;;  %v2009_v1 = vsel %vm849_vm4, %v1944_v33, 0  ;;  %vm2025_vm15 = vcmp.ne.s16.totalorder %v3006_v10, 0  ;;  %v2026_v7 = vsel %vm878_vm8, %v1944_v33, 0  ;;  %vm2056_vm5 = vcmp.ne.s16.totalorder %v2963_v57, 0  ;;  %vm3577_vm4 = vmmov %vm3572_vm6 }
 0x699   : > { %v2041_v25 = vld [vmem:[#allocation2 + $0x8] sm:$0xf]  ;;  %v2057_v14 = vsel %vm927_vm0, %v1944_v33, 0  ;;  %v2086_v10 = vld [vmem:[%s3494_s11] sm:$0xff]  ;;  %v2088_v57 = vld [vmem:[%s3494_s11 + $0x10] sm:$0xff]  ;;  %vm3578_vm8 = vcmask 1039360  }
 0x69a   : > { %v1959_v36 = vld [vmem:[#allocation2 + $0x8] sm:$0xf]  ;;  %vm3579_vm0 = vmmov %vm3577_vm4  ;;  %vm3580_vm6 = vcmask 908288  }
 0x69b   : > { %1996 = vrot.lane.b32.xlu1 %v1944_v33, %s2762_s15  ;;  %v1962_v38 = vsel %vm1960_vm1, %v1959_v36, 0  ;;  %v1976_v19 = vld [vmem:[#allocation2 + $0x8] sm:$0xf]  ;;  %vm3581_vm14 = vmmov %vm3579_vm0  ;;  %vm3588_vm1 = vcmask 900096  }
 0x69c   : > { %1998 = vrot.lane.b32.xlu0 %v1993_v35, %s2762_s15  ;;  %v1979_v40 = vsel %vm1977_vm2, %v1976_v19, 0  ;;  %v2007_v55 = vld [vmem:[#allocation2 + $0x8] sm:$0xf]  ;;  %vm3583_vm12 = vmmov %vm3579_vm0 }
 0x69d   : > { %v2010_v41 = vsel %vm2008_vm9, %v2007_v55, 0  ;;  %v2024_v0 = vld [vmem:[#allocation2 + $0x8] sm:$0xf]  ;;  %vm3585_vm13 = vmmov %vm3579_vm0  ;;  %vm3590_vm9 = vcmask 785408  }
 0x69e   : > { %v2027_v62 = vsel %vm2025_vm15, %v2024_v0, 0  ;;  %v2055_v5 = vld [vmem:[#allocation2 + $0x8] sm:$0xf]  ;;  %vm3587_vm11 = vmmov %vm3579_vm0 }
 0x69f   : > { %2044 = vrot.lane.b32.xlu1 %v1944_v33, %s2763_s16  ;;  %v2058_v42 = vsel %vm2056_vm5, %v2055_v5, 0  ;;  %vm3589_vm2 = vmmov %vm3579_vm0  ;;  %vm3592_vm5 = vcmask 769024  }
 0x6a0   : > { %2046 = vrot.lane.b32.xlu0 %v2041_v25, %s2763_s16  ;;  %vm3591_vm15 = vmmov %vm3579_vm0  ;;  %s3430_s16 = scalar_lea.hbm %s3495_s12, %s2571_s30 }
 0x6a3   : > { %1965 = vrot.lane.b32.xlu1 %v1961_v37, %s2764_s17 }
 0x6a4   : > { %1967 = vrot.lane.b32.xlu0 %v1962_v38, %s2764_s17  ;;  %s3436_s17 = scalar_lea.sflag [#allocation7], %s517_s28 }
 0x6a7   : > { %1982 = vrot.lane.b32.xlu1 %v1978_v39, %s2765_s18 }
 0x6a8   : > { %1984 = vrot.lane.b32.xlu0 %v1979_v40, %s2765_s18 }
 0x6ab   : > { %2013 = vrot.lane.b32.xlu1 %v2009_v1, %s2766_s19 }
 0x6ac   : > { %2015 = vrot.lane.b32.xlu0 %v2010_v41, %s2766_s19  ;;  %s2772_s19 = smov [#allocation6]  }
 0x6af   : > { %2030 = vrot.lane.b32.xlu1 %v2026_v7, %s2767_s20 }
 0x6b0   : > { %2032 = vrot.lane.b32.xlu0 %v2027_v62, %s2767_s20  ;;  %s2677_s20 = sshll.u32 %s2772_s19, 4  ;;  %s2678_s20 = int_to_ptr.vmem [resolvable:$false] %s2677_s20 }
 0x6b3   : > { %2061 = vrot.lane.b32.xlu1 %v2057_v14, %s3553_s27 }
 0x6b4   : > { %2063 = vrot.lane.b32.xlu0 %v2058_v42, %s3553_s27  ;;  %s2568_s27 = smul.u32 96, %s517_s28 }
 0x6b6   : > { %s3411_s7 = scalar_lea.vmem [#allocation6], %s2568_s27  ;;  %s2679_s27 = scalar_lea.vmem %s2678_s20, 3072 }
 0x6b7   : > { %2094 = vperm.xlu1 %2647, %v2086_v10   ;;  %s2288_s14 = sshll.u32 %s3411_s7, 4  ;;  %s3424_s14 = int_to_ptr.vmem [resolvable:$true] %s2288_s14 }
 0x6b8   : > { %2099 = vperm.xlu0 %2648, %v2087_v21   ;;  %s2673_s18 = scalar_lea.vmem %s3424_s14, 1536  ;;  %p2680_p1 = scmp.lt.s32.totalorder %s3424_s14, %s2678_s20 }
 0x6b9   : > { %p2674_p12 = scmp.ne.s32.totalorder %s3424_s14, %s2673_s18  ;;  %p2681_p2 = scmp.lt.s32.totalorder %s2679_s27, %s2673_s18 }
 0x6bb   : > { %2104 = vperm.xlu1 %2647, %v2088_v57   ;;  %v2670_v57 = vld [vmem:[%s3493_s10] sm:$0xff]   ;;  %p2675_p13 = pnand %p2674_p12, %p2882_p4  ;;  %p2682_p3 = por %p2681_p2, %p2680_p1 }
 0x6bc   : > { %2109 = vperm.xlu0 %2648, %v2089_v27   ;;  %v2671_v27 = vld [vmem:[%s3493_s10 + $0x8] sm:$0xff]  }
 0x6bd   : > { %p2676_p0 = pneg %p2675_p13 }
 0x6bf   : > { %2114 = vperm.xlu1 %2647, %v2090_v43   ;;  %v2672_v43 = vld [vmem:[%s3493_s10 + $0x10] sm:$0xff]   ;;  %p2683_p5 = pnand %p2682_p3, %p2676_p0 }
 0x6c0   : > { %2119 = vperm.xlu0 %2648, %v2091_v44  }
 0x709   : > { %v1949_v45 = vpop.permute.xlu1 %1948 }
 0x70a   : > { %v1951_v47 = vpop.permute.xlu0 %1950  ;;  %v1952_v48 = vrot.slane %v1949_v45, 4 }
 0x70b   : > { %v1953_v46 = vrot.slane %v1951_v47, 4 }
 0x70d   : > { %v1954_v49 = vsel %vm3577_vm4, %v1952_v48, %v1953_v46  ;;  %v1997_v52 = vpop.permute.xlu1 %1996  ;;  %vm3593_vm4 = vmmov %vm3579_vm0 }
 0x70e   : > { %v1955_v51 = vsel %vm3578_vm8, %v1949_v45, %v1954_v49  ;;  %v1999_v53 = vpop.permute.xlu0 %1998  ;;  %v2000_v54 = vrot.slane %v1997_v52, 4  ;;  %vm3594_vm8 = vmmov %vm3579_vm0 }
 0x70f   : > { %v2001_v50 = vrot.slane %v1999_v53, 4  ;;  %v2480_v56 = vcombine.low %v3325_v17, %v1955_v51  ;;  %v2481_v60 = vcombine.high %v3325_v17, %v1955_v51 }
 0x711   : > { %v2002_v61 = vsel %vm3579_vm0, %v2000_v54, %v2001_v50  ;;  %2197 = vmatprep.subr.bf16.mxu0 %v2481_v60  ;;  %v2045_v3 = vpop.permute.xlu1 %2044  ;;  %vm3595_vm0 = vcmask 588800  }
 0x712   : > { %v2003_v2 = vsel %vm3580_vm6, %v1997_v52, %v2002_v61  ;;  %v2047_v8 = vpop.permute.xlu0 %2046  ;;  %2198 = vmatpush1.bf16.msra.mxu0 %v2480_v56  ;;  %v2048_v58 = vrot.slane %v2045_v3, 4  ;;  %vm3596_vm6 = vmmov %vm3595_vm0 }
 0x713   : > { %v2049_v9 = vrot.slane %v2047_v8, 4 }
 0x715   : > { %v2050_v12 = vsel %vm3581_vm14, %v2048_v58, %v2049_v9  ;;  %v1966_v15 = vpop.permute.xlu1 %1965  ;;  %vm3597_vm14 = vmmov %vm3595_vm0 }
 0x716   : > { %v2051_v13 = vsel %vm3582_vm3, %v2045_v3, %v2050_v12  ;;  %v1968_v16 = vpop.permute.xlu0 %1967  ;;  %v1969_v18 = vrot.slane %v1966_v15, 4 }
 0x717   : > { %v1970_v20 = vrot.slane %v1968_v16, 4 }
 0x719   : > { %v1971_v22 = vsel %vm3583_vm12, %v1969_v18, %v1970_v20  ;;  %v1983_v24 = vpop.permute.xlu1 %1982 }
 0x71a   : > { %v1972_v23 = vsel %vm3584_vm10, %v1966_v15, %v1971_v22  ;;  %v1985_v59 = vpop.permute.xlu0 %1984  ;;  %v1986_v26 = vrot.slane %v1983_v24, 4 }
 0x71b   : > { %v1987_v63 = vrot.slane %v1985_v59, 4 }
 0x71d   : > { %v1988_v28 = vsel %vm3585_vm13, %v1986_v26, %v1987_v63  ;;  %v2014_v6 = vpop.permute.xlu1 %2013 }
 0x71e   : > { %v1989_v29 = vsel %vm3586_vm7, %v1983_v24, %v1988_v28  ;;  %v2016_v30 = vpop.permute.xlu0 %2015  ;;  %v2017_v31 = vrot.slane %v2014_v6, 4 }
 0x71f   : > { %v2018_v32 = vrot.slane %v2016_v30, 4  ;;  %v2482_v11 = vcombine.low %v1972_v23, %v1989_v29  ;;  %v2483_v33 = vcombine.high %v1972_v23, %v1989_v29 }
 0x721   : > { %v2019_v34 = vsel %vm3587_vm11, %v2017_v31, %v2018_v32  ;;  %2199 = vmatprep.subr.bf16.mxu0 %v2483_v33  ;;  %v2031_v17 = vpop.permute.xlu1 %2030 }
 0x722   : > { %v2020_v35 = vsel %vm3588_vm1, %v2014_v6, %v2019_v34  ;;  %v2033_v25 = vpop.permute.xlu0 %2032  ;;  %2200 = vmatpush1.bf16.msra.mxu0 %v2482_v11  ;;  %v2034_v36 = vrot.slane %v2031_v17, 4 }
 0x723   : > { %v2035_v37 = vrot.slane %v2033_v25, 4  ;;  %v2484_v38 = vcombine.low %v2003_v2, %v2020_v35  ;;  %v2485_v19 = vcombine.high %v2003_v2, %v2020_v35 }
 0x725   : > { %v2036_v39 = vsel %vm3589_vm2, %v2034_v36, %v2035_v37  ;;  %2201 = vmatprep.subr.bf16.mxu0 %v2485_v19  ;;  %v2062_v55 = vpop.permute.xlu1 %2061 }
 0x726   : > { %v2037_v40 = vsel %vm3590_vm9, %v2031_v17, %v2036_v39  ;;  %v2064_v1 = vpop.permute.xlu0 %2063  ;;  %2202 = vmatpush1.bf16.msra.mxu0 %v2484_v38  ;;  %v2065_v41 = vrot.slane %v2062_v55, 4 }
 0x727   : > { %v2066_v0 = vrot.slane %v2064_v1, 4  ;;  %v2486_v7 = vcombine.low %v2037_v40, %v2051_v13  ;;  %v2487_v62 = vcombine.high %v2037_v40, %v2051_v13 }
 0x729   : > { %v2067_v5 = vsel %vm3591_vm15, %v2065_v41, %v2066_v0  ;;  %2203 = vmatprep.subr.bf16.mxu0 %v2487_v62 }
 0x72a   : > { %v2068_v14 = vsel %vm3592_vm5, %v2062_v55, %v2067_v5  ;;  %2204 = vmatpush1.bf16.msra.mxu0 %v2486_v7 }
 0x72b   : > { %v2489_v42 = vcombine.high %v2068_v14, %v2068_v14  ;;  %v2488_v10 = vcombine.low %v2068_v14, %v2068_v14 }
 0x72d   : > { %2490 = vmatprep.subr.msk.bf16.mxu0 %vm3593_vm4, %v2489_v42  ;;  %v2192_v21 = vsel %vm3594_vm8, %v2488_v10, 0 }
 0x72e   : > { %2206 = vmatpush1.bf16.msra.mxu0 %v2192_v21 }
 0x731   : > { %2491 = vmatmul.mubr.msk.bf16.vlgmr.msra.gmra.mrb[8].mxu0 %vm3595_vm0, %v2670_v57 }
 0x732   : > { %2239 = vmatprep.mubr.bf16.mxu0 %v2754_v4 }
 0x736   : > { %v2095_v44 = vpop.permute.xlu1 %2094 }
 0x737   : > { %v2100_v46 = vpop.permute.xlu0 %2099 }
 0x739   : > { %2492 = vmatmul.mubr.msk.bf16.gmra.mrb[12].mxu0 %vm3596_vm6, %v2671_v27 }
 0x73a   : > { %2249 = vmatprep.mubr.bf16.mxu0 %v2754_v4  ;;  %v2105_v54 = vpop.permute.xlu1 %2104 }
 0x73b   : > { %v2110_v61 = vpop.permute.xlu0 %2109 }
 0x73e   : > { %v2115_v12 = vpop.permute.xlu1 %2114 }
 0x73f   : > { %v2120_v18 = vpop.permute.xlu0 %2119 }
 0x741   : > { %2493 = vmatmul.mubr.msk.bf16.gmra.mrb[16].mxu0 %vm3597_vm14, %v2672_v43 }
 0x804   : > { %v2231_v45 = vpop.f32.mrb[8].mxu0 }
 0x805   : > { %v2232_v47 = vadd.f32 %v2231_v45, %v2095_v44  ;;  %v2233_v48 = vpop.f32.mrb[9].mxu0 }
 0x806   : > { %v2234_v49 = vadd.f32 %v2233_v48, %v2095_v44  ;;  %v2235_v51 = vpop.f32.mrb[10].mxu0 }
 0x807   : > { %2260 = vst [vmem:[%s3411_s7] sm:$0xff] %v2232_v47  ;;  %v2236_v4 = vadd.f32 %v2235_v51, %v2100_v46  ;;  %v2237_v52 = vpop.f32.mrb[11].mxu0 }
 0x808   : > { %2261 = vst [vmem:[%s3411_s7 + $0x8] sm:$0xff] %v2234_v49  ;;  %v2238_v53 = vadd.f32 %v2237_v52, %v2100_v46 }
 0x809   : > { %2262 = vst [vmem:[%s3411_s7 + $0x10] sm:$0xff] %v2236_v4 }
 0x80a   : > { %2263 = vst [vmem:[%s3411_s7 + $0x18] sm:$0xff] %v2238_v53 }
 0x80c   : > { %v2241_v50 = vpop.f32.mrb[12].mxu0 }
 0x80d   : > { %v2242_v56 = vadd.f32 %v2241_v50, %v2105_v54  ;;  %v2243_v60 = vpop.f32.mrb[13].mxu0 }
 0x80e   : > { %v2244_v2 = vadd.f32 %v2243_v60, %v2105_v54  ;;  %v2245_v3 = vpop.f32.mrb[14].mxu0 }
 0x80f   : > { %2264 = vst [vmem:[%s3411_s7 + $0x20] sm:$0xff] %v2242_v56  ;;  %v2246_v8 = vadd.f32 %v2245_v3, %v2110_v61  ;;  %v2247_v58 = vpop.f32.mrb[15].mxu0 }
 0x810   : > { %2265 = vst [vmem:[%s3411_s7 + $0x28] sm:$0xff] %v2244_v2  ;;  %v2248_v9 = vadd.f32 %v2247_v58, %v2110_v61 }
 0x811   : > { %2266 = vst [vmem:[%s3411_s7 + $0x30] sm:$0xff] %v2246_v8 }
 0x812   : > { %2267 = vst [vmem:[%s3411_s7 + $0x38] sm:$0xff] %v2248_v9 }
 0x814   : > { %v2251_v13 = vpop.f32.mrb[16].mxu0 }
 0x815   : > { %v2252_v15 = vadd.f32 %v2251_v13, %v2115_v12  ;;  %v2253_v16 = vpop.f32.mrb[17].mxu0 }
 0x816   : > { %v2254_v20 = vadd.f32 %v2253_v16, %v2115_v12  ;;  %v2255_v22 = vpop.f32.mrb[18].mxu0 }
 0x817   : > { %2268 = vst [vmem:[%s3411_s7 + $0x40] sm:$0xff] %v2252_v15  ;;  %v2256_v23 = vadd.f32 %v2255_v22, %v2120_v18  ;;  %v2257_v24 = vpop.f32.mrb[19].mxu0 }
 0x818   : > { %2269 = vst [vmem:[%s3411_s7 + $0x48] sm:$0xff] %v2254_v20  ;;  %v2258_v59 = vadd.f32 %v2257_v24, %v2120_v18 }
 0x819   : > { %2270 = vst [vmem:[%s3411_s7 + $0x50] sm:$0xff] %v2256_v23 }
 0x81a   : > { %2271 = vst [vmem:[%s3411_s7 + $0x58] sm:$0xff] %v2258_v59 }
 0x81b   : > { %2686 = shalt.err (!%p2683_p5)
}
 0x81c   : > { %s2687_s28 = scalar_lea.hbm %s3430_s16, 1536  ;;  %s2691_s15 = scalar_lea.hbm %s3495_s12, 3072 }
 0x81d   : > { %p2688_p6 = scmp.ne.s32.totalorder %s3430_s16, %s2687_s28  ;;  %p2692_p10 = scmp.lt.u32.totalorder %s3430_s16, %s3495_s12 }
 0x81e   : > { %p2693_p11 = scmp.lt.u32.totalorder %s2691_s15, %s2687_s28  ;;  %p2695_p13 = scmp.lt.u32.totalorder %s2687_s28, %s3430_s16 }
 0x81f   : > { %p2689_p7 = pnand %p2688_p6, %p2882_p4 }
 0x820   : > { %p2694_p12 = por %p2693_p11, %p2692_p10 }
 0x821   : > { %p2690_p9 = pneg %p2689_p7 }
 0x822   : > { %p2696_p0 = por %p2695_p13, %p2694_p12 }
 0x824   : > { %p2697_p1 = pnand %p2696_p0, %p2690_p9 }
 0x826   : > { %2700 = shalt.err (!%p2697_p1)
}
 0x827   : > { %s2773_s18 = smov 256   ;;  %s3598_s20 = smov 16  }
 0x828   : > { %2572 = dma.vmem_to_hbm [thread:$0]  (%p2882_p4), %s3424_s14, 1536, %s3430_s16, %s3436_s17, %s2773_s18, %s2773_s18, %s3598_s20  }
 0x829 PF: > { %p2578_p2 = scmp.ge.s32.totalorder %s2751_s26, 2  ;;  %s2303_s27 = sand.u32 1, %s2731_s21  }
 0x82a   : > { %s2304_s28 = scalar_lea.sflag [#allocation7], %s2303_s27 }
 0x82b   : > { %p2575_p3 = pnand %p2578_p2, %p2889_p8 }
 0x82d   : > { %2726 = dma.done.wait (!%p2575_p3), %s2304_s28, 1536  }
 0x82e   : > { %2728 = vsyncadd (!%p2575_p3), %s2304_s28, 4294965760  ;;  %s27_s26 = sadd.s32 1, %s2751_s26   ;;  %s3599_s21 = smov %s2735_s22 }
 0x82f   : > { %p24_p5 = scmp.ge.s32.totalorder %s27_s26, 4   ;;  %s3600_s22 = smov %s2739_s23 }
 0x830   : > { %s3601_s23 = smov %s2895_s13  ;;  %s3602_s24 = smov %s2747_s25 }
 0x831   : > { %s3603_s25 = smov %s3605_s0  ;;  %26 = sbr.rel (!%p24_p5) target bundleno = 7 (0x7), region = 121 }
 0x838   :  { %2309 = vsyncpa [#allocation7], 1 }
 0x839   :  { %2311 = vsyncpa [#allocation7 + $0x1], 1 }

</bundles_post_ra>
